<compile_context>
chip_gen: v6e
topology: v6e:2x2x1
jax: 0.10.0
libtpu: 0.0.40
codegen_flags: <defaults>
</compile_context>

<pallas_src>
import jax
import jax.numpy as jnp
from jax.experimental import pallas as pl
from jax.experimental.pallas import tpu as pltpu

_LANES = 128
_C_ALIGN = 16      # channel padding so bf16 sublane concats are tile aligned


def _round_up(x, m):
    return (x + m - 1) // m * m


def _layout_dims(H, W):
    """Shared layout constants for the padded-flat spatial layout."""
    Wp = W + 2
    L = H * Wp                                   # logical output length
    Lpad = _round_up(L, _LANES)                  # lane-dense matmul / store width
    Lin = _round_up(Lpad + 2 * Wp + 2, _LANES)   # input slab width (>= Hp*Wp)
    return Wp, L, Lpad, Lin


# ----------------------------- Pallas kernels ------------------------------

def _make_conv_kernel(Wp, Lpad, Lin, rows_out, *, embed_out, with_stats, count):
    """3x3x3 conv (stride 1, pad 1) over one (n, depth) tile.

    Refs (in order):
      x0, x1, x2 : (1, 1, Cp, Lin)   bf16  padded depth slices (kd = 0, 1, 2)
      w          : (9, rows_out, 3*Cp) bf16  per-(kh,kw) folded weights
      b          : (rows_out, 1)     f32
      m          : (1, Lpad)         f32   1.0 on valid width columns
      y          : output block
      [s]        : (1, 2, 128)       f32   per-sample mean / inv_std
      [vstat]    : VMEM (2, rows_out, Lpad) f32 running sum / sum-of-squares
    """

    def compute_acc(x0, x1, x2, w_ref, b_ref):
        # halo'd slab: 3 depth slices stacked along sublanes -> (3*Cp, Lin)
        big = jnp.concatenate([x0[0, 0], x1[0, 0], x2[0, 0]], axis=0)
        acc = None
        for kh in range(3):
            for kw in range(3):
                j = kh * 3 + kw
                off = kh * Wp + kw
                part = jnp.dot(w_ref[j], big[:, off:off + Lpad],
                               preferred_element_type=jnp.float32)
                acc = part if acc is None else acc + part
        return acc + b_ref[...]                               # (rows_out, Lpad) f32

    def kernel(x0, x1, x2, w_ref, b_ref, m_ref, y_ref, *rest):
        if embed_out:
            # grid axis 1 runs over D+2 *output* depths; edges are zero halos.
            od = pl.program_id(1)
            last = pl.num_programs(1) - 1
            interior = jnp.logical_and(od > 0, od < last)

            @pl.when(jnp.logical_not(interior))
            def _():
                y_ref[0, 0] = jnp.zeros((rows_out, Lin), y_ref.dtype)

            @pl.when(interior)
            def _():
                acc = compute_acc(x0, x1, x2, w_ref, b_ref)
                masked = (acc * m_ref[...]).astype(y_ref.dtype)
                # embed at lane offset Wp+1 -> exactly the padded flat layout
                zpre = jnp.zeros((rows_out, Wp + 1), y_ref.dtype)
                zpost = jnp.zeros((rows_out, Lin - Wp - 1 - Lpad), y_ref.dtype)
                y_ref[0, 0] = jnp.concatenate([zpre, masked, zpost], axis=1)
            return

        acc = compute_acc(x0, x1, x2, w_ref, b_ref)

        if not with_stats:
            y_ref[0, 0] = acc.astype(y_ref.dtype)
            return

        s_ref, vstat = rest
        d = pl.program_id(1)
        masked = acc * m_ref[...]                 # zero garbage width columns
        y_ref[0, 0] = masked.astype(y_ref.dtype)

        @pl.when(d == 0)
        def _():
            vstat[...] = jnp.zeros_like(vstat)

        # pure VPU accumulation (no per-step XLU reductions)
        vstat[0] = vstat[0] + masked
        vstat[1] = vstat[1] + masked * masked

        @pl.when(d == pl.num_programs(1) - 1)
        def _():
            total = jnp.sum(vstat[0])
            sq = jnp.sum(vstat[1])
            mean = total / count
            var = sq / count - mean * mean
            inv = jax.lax.rsqrt(var + 1e-5)
            s_ref[0, 0:1, :] = jnp.full((1, _LANES), mean, jnp.float32)
            s_ref[0, 1:2, :] = jnp.full((1, _LANES), inv, jnp.float32)

    return kernel


def _gn_apply_kernel(y_ref, s_ref, g_ref, b_ref, o_ref):
    # per-sample GroupNorm(1) affine + LeakyReLU(0.2): one FMA + select per elem
    mean = s_ref[0, 0:1, 0:1]                       # (1, 1)
    inv = s_ref[0, 1:2, 0:1]                        # (1, 1)
    scale = inv * g_ref[...]                        # (Coutp, 1)
    shift = b_ref[...] - mean * scale               # (Coutp, 1)
    v = y_ref[0, 0].astype(jnp.float32) * scale + shift
    o_ref[0, 0] = jnp.where(v > 0, v, 0.2 * v).astype(o_ref.dtype)


# ------------------------------ wrappers ------------------------------------

def _vmem_limit_bytes(need):
    try:
        cap = int(pltpu.get_tpu_info().vmem_capacity_bytes)
    except Exception:
        cap = 64 * 2 ** 20          # conservative (v7x physical VMEM)
    limit = max(48 * 2 ** 20, int(1.5 * need) + (4 << 20))
    return int(min(limit, cap - 4 * 2 ** 20))


def _conv_pallas(xint, wmat, bias, mask, *, Wp, Lpad, Lin,
                 embed_out, with_stats=False, count=None, out_dtype=jnp.float32):
    """k=3, s=1, p=1 conv over the padded internal layout.

    xint: (N, D+2, Cp, Lin) bf16, zero halos / borders / lane tail.
    Returns:
      embed_out=True : (N, D+2, rows_out, Lin)  padded layout (next conv's input)
      embed_out=False: (N, D,   rows_out, Lpad) [, stats (N, 2, 128)]
    """
    N, Din, Cp, Lin_x = xint.shape
    assert Lin_x == Lin
    _, rows_out, K3 = wmat.shape
    D = Din - 2
    b2 = bias.reshape(rows_out, 1).astype(jnp.float32)

    if embed_out:
        grid = (N, Din)
        x_maps = [lambda n, od: (n, jnp.maximum(od - 1, 0), 0, 0),
                  lambda n, od: (n, od, 0, 0),
                  lambda n, od: (n, jnp.minimum(od + 1, Din - 1), 0, 0)]
        out_depth, out_len = Din, Lin
        dims = ("parallel", "parallel")
    else:
        grid = (N, D)
        x_maps = [lambda n, d: (n, d, 0, 0),
                  lambda n, d: (n, d + 1, 0, 0),
                  lambda n, d: (n, d + 2, 0, 0)]
        out_depth, out_len = D, Lpad
        dims = ("parallel", "arbitrary" if with_stats else "parallel")

    in_specs = [pl.BlockSpec((1, 1, Cp, Lin), x_maps[0]),
                pl.BlockSpec((1, 1, Cp, Lin), x_maps[1]),
                pl.BlockSpec((1, 1, Cp, Lin), x_maps[2]),
                pl.BlockSpec((9, rows_out, K3), lambda n, d: (0, 0, 0)),
                pl.BlockSpec((rows_out, 1), lambda n, d: (0, 0)),
                pl.BlockSpec((1, Lpad), lambda n, d: (0, 0))]

    out_shapes = [jax.ShapeDtypeStruct((N, out_depth, rows_out, out_len), out_dtype)]
    out_specs = [pl.BlockSpec((1, 1, rows_out, out_len), lambda n, d: (n, d, 0, 0))]
    scratch = []
    if with_stats:
        out_shapes.append(jax.ShapeDtypeStruct((N, 2, _LANES), jnp.float32))
        out_specs.append(pl.BlockSpec((1, 2, _LANES), lambda n, d: (n, 0, 0)))
        scratch = [pltpu.VMEM((2, rows_out, Lpad), jnp.float32)]

    # VMEM accounting: double-buffered blocks + in-kernel temporaries.
    osz = jnp.dtype(out_dtype).itemsize
    block_in = 3 * Cp * Lin * 2
    block_w = 9 * rows_out * K3 * 2
    block_out = rows_out * out_len * osz
    temps = (3 * Cp * Lin * 2               # halo slab
             + 2 * 3 * Cp * Lpad * 2        # shifted dot operands
             + rows_out * Lpad * 4          # f32 accumulator
             + 2 * rows_out * out_len * osz)  # epilogue copies
    stats_b = 2 * rows_out * Lpad * 4 if with_stats else 0
    need = 2 * (block_in + block_out) + 2 * block_w + temps + stats_b + (1 << 20)

    kernel = _make_conv_kernel(
        Wp, Lpad, Lin, rows_out, embed_out=embed_out, with_stats=with_stats,
        count=float(count) if count is not None else None)

    return pl.pallas_call(
        kernel,
        out_shape=tuple(out_shapes) if with_stats else out_shapes[0],
        grid_spec=pltpu.PrefetchScalarGridSpec(
            num_scalar_prefetch=0,
            grid=grid,
            in_specs=in_specs,
            out_specs=tuple(out_specs) if with_stats else out_specs[0],
            scratch_shapes=scratch),
        compiler_params=pltpu.CompilerParams(
            dimension_semantics=dims,
            vmem_limit_bytes=_vmem_limit_bytes(need)),
    )(xint, xint, xint, wmat, b2, mask)


def _gn_leaky_apply(y, stats, gamma_p, beta_p):
    N, D, rows, Lpad = y.shape
    g = gamma_p.reshape(rows, 1).astype(jnp.float32)
    b = beta_p.reshape(rows, 1).astype(jnp.float32)
    return pl.pallas_call(
        _gn_apply_kernel,
        out_shape=jax.ShapeDtypeStruct((N, D, rows, Lpad), jnp.float32),
        grid_spec=pltpu.PrefetchScalarGridSpec(
            num_scalar_prefetch=0,
            grid=(N, D),
            in_specs=[pl.BlockSpec((1, 1, rows, Lpad), lambda n, d: (n, d, 0, 0)),
                      pl.BlockSpec((1, 2, _LANES), lambda n, d: (n, 0, 0)),
                      pl.BlockSpec((rows, 1), lambda n, d: (0, 0)),
                      pl.BlockSpec((rows, 1), lambda n, d: (0, 0))],
            out_specs=pl.BlockSpec((1, 1, rows, Lpad), lambda n, d: (n, d, 0, 0))),
        compiler_params=pltpu.CompilerParams(
            dimension_semantics=("parallel", "parallel")),
    )(y, stats, g, b)


def _fold_weights(w, b, cin_p, cout_p):
    """(Cout, Cin, 3, 3, 3) -> (9, Coutp, 3*Cinp); j = kh*3+kw, cols (kd, cin)."""
    cout, cin = w.shape[0], w.shape[1]
    wp = jnp.pad(w, ((0, cout_p - cout), (0, cin_p - cin),
                     (0, 0), (0, 0), (0, 0)))
    wmat = jnp.transpose(wp, (3, 4, 0, 2, 1)).reshape(9, cout_p, 3 * cin_p)
    bp = jnp.pad(b, (0, cout_p - cout))
    return wmat.astype(jnp.bfloat16), bp.astype(jnp.float32)


class BasicConv3dPallas:
    """Pallas port of BasicConv3d (transpose=False, groups=1, k=3, s=1, p=1)."""

    def __init__(self, in_channels, channels, out_channels, act_norm=False, *, key):
        ks = jax.random.split(key, 6)
        self.act_norm = act_norm
        self.cin, self.cmid, self.cout = in_channels, channels, out_channels

        # parameters in PyTorch layout (source of truth for the reference)
        self.w_in = 0.1 * jax.random.normal(ks[0], (channels, in_channels, 3, 3, 3), jnp.float32)
        self.b_in = 0.1 * jax.random.normal(ks[1], (channels,), jnp.float32)
        self.w = 0.1 * jax.random.normal(ks[2], (out_channels, channels, 3, 3, 3), jnp.float32)
        self.b = 0.1 * jax.random.normal(ks[3], (out_channels,), jnp.float32)
        self.gamma = 1.0 + 0.1 * jax.random.normal(ks[4], (out_channels,), jnp.float32)
        self.beta = 0.1 * jax.random.normal(ks[5], (out_channels,), jnp.float32)

        self.cin_p = _round_up(in_channels, _C_ALIGN)
        self.cmid_p = _round_up(channels, _C_ALIGN)
        self.cout_p = _round_up(out_channels, _C_ALIGN)
        self.w_in_mat, self.b_in_p = _fold_weights(self.w_in, self.b_in,
                                                   self.cin_p, self.cmid_p)
        self.w_mat, self.b_p = _fold_weights(self.w, self.b,
                                             self.cmid_p, self.cout_p)
        self.gamma_p = jnp.pad(self.gamma, (0, self.cout_p - out_channels),
                               constant_values=1.0)
        self.beta_p = jnp.pad(self.beta, (0, self.cout_p - out_channels))

    def __call__(self, x_ncdhw):
        N, C, D, H, W = x_ncdhw.shape
        Wp, L, Lpad, Lin = _layout_dims(H, W)
        Hp = H + 2

        # NCDHW -> padded internal layout (N, D+2, Cin_p, Lin), zero halos/borders
        x = jnp.transpose(x_ncdhw, (0, 2, 1, 3, 4)).astype(jnp.bfloat16)
        x = jnp.pad(x, ((0, 0), (1, 1), (0, self.cin_p - C), (1, 1), (1, 1)))
        x = x.reshape(N, D + 2, self.cin_p, Hp * Wp)
        x = jnp.pad(x, ((0, 0), (0, 0), (0, 0), (0, Lin - Hp * Wp)))

        idx = jnp.arange(Lpad, dtype=jnp.int32)
        mask = jnp.logical_and(idx < L, (idx % Wp) < W)
        mask = mask.astype(jnp.float32).reshape(1, Lpad)

        # conv_in: output written directly in the padded layout conv consumes
        y1 = _conv_pallas(x, self.w_in_mat, self.b_in_p, mask,
                          Wp=Wp, Lpad=Lpad, Lin=Lin,
                          embed_out=True, out_dtype=jnp.bfloat16)

        if self.act_norm:
            count = self.cout * D * H * W
            y2, stats = _conv_pallas(y1, self.w_mat, self.b_p, mask,
                                     Wp=Wp, Lpad=Lpad, Lin=Lin,
                                     embed_out=False, with_stats=True,
                                     count=count, out_dtype=jnp.bfloat16)
            y2 = _gn_leaky_apply(y2, stats, self.gamma_p, self.beta_p)
        else:
            y2 = _conv_pallas(y1, self.w_mat, self.b_p, mask,
                              Wp=Wp, Lpad=Lpad, Lin=Lin,
                              embed_out=False, out_dtype=jnp.float32)

        # de-pad: (N, D, Coutp, Lpad) -> NCDHW
        y2 = y2[..., :L].reshape(N, D, self.cout_p, H, Wp)[..., :W]
        y2 = y2[:, :, :self.cout]
        return jnp.transpose(y2, (0, 2, 1, 3, 4))


# --------------------------- pure-JAX reference ------------------------------

def _ref_forward(x_ncdhw, mod):
    def conv(x, w, b):
        y = jax.lax.conv_general_dilated(
            x.astype(jnp.bfloat16), w.astype(jnp.bfloat16),
            window_strides=(1, 1, 1),
            padding=((1, 1), (1, 1), (1, 1)),
            dimension_numbers=("NCDHW", "OIDHW", "NCDHW"),
            preferred_element_type=jnp.float32)
        return y + b[None, :, None, None, None]

    x1 = conv(x_ncdhw, mod.w_in, mod.b_in).astype(jnp.bfloat16)   # mirror bf16
    y = conv(x1, mod.w, mod.b)
    if mod.act_norm:
        n = y.shape[0]
        mean = y.reshape(n, -1).mean(axis=1).reshape(n, 1, 1, 1, 1)
        var = jnp.square(y - mean).reshape(n, -1).mean(axis=1).reshape(n, 1, 1, 1, 1)
        yn = (y - mean) * jax.lax.rsqrt(var + 1e-5)
        yn = yn * mod.gamma[None, :, None, None, None] + mod.beta[None, :, None, None, None]
        y = jnp.where(yn > 0, yn, 0.2 * yn)
    return y


if __name__ == "__main__":
    key = jax.random.PRNGKey(0)
    k_x, k_p1, k_p2 = jax.random.split(key, 3)
    N, Cin, Cmid, Cout, D, H, W = 2, 4, 8, 8, 4, 8, 8
    x = jax.random.normal(k_x, (N, Cin, D, H, W), jnp.float32)

    ok = True
    for act_norm, k_p in ((True, k_p1), (False, k_p2)):
        mod = BasicConv3dPallas(Cin, Cmid, Cout, act_norm=act_norm, key=k_p)
        out = jax.block_until_ready(jax.jit(mod.__call__)(x))
        ref = jax.block_until_ready(_ref_forward(x, mod))
        assert out.shape == (N, Cout, D, H, W), out.shape
        err = float(jnp.max(jnp.abs(out.astype(jnp.float32) - ref)))
        if not jnp.allclose(out.astype(jnp.float32), ref, atol=2e-2, rtol=2e-2):
            ok = False
            print(f"mismatch (act_norm={act_norm}): max abs err = {err}")
    if ok:
        print("KERNEL_OK")
</pallas_src>

<mosaic_0001>
module attributes {stable_mosaic.version = 11 : i64} {
  func.func @kernel(%arg0: i32, %arg1: i32, %arg2: memref<1x1x16x256xbf16, #tpu.memory_space<vmem>>, %arg3: memref<1x1x16x256xbf16, #tpu.memory_space<vmem>>, %arg4: memref<1x1x16x256xbf16, #tpu.memory_space<vmem>>, %arg5: memref<9x16x48xbf16, #tpu.memory_space<vmem>>, %arg6: memref<16x1xf32, #tpu.memory_space<vmem>>, %arg7: memref<1x128xf32, #tpu.memory_space<vmem>>, %arg8: memref<1x1x16x128xbf16, #tpu.memory_space<vmem>>, %arg9: memref<1x2x128xf32, #tpu.memory_space<vmem>>, %arg10: memref<2x16x128xf32, #tpu.memory_space<vmem>>) attributes {dimension_semantics = [#tpu.dimension_semantics<parallel>, #tpu.dimension_semantics<arbitrary>], iteration_bounds = array<i64: 2, 4>, scalar_prefetch = 0 : i64, scratch_operands = 1 : i64, tpu.core_type = #tpu.core_type<tc>, window_params = [{transform_indices = @transform_0, window_bounds = array<i64: 1, 1, 16, 256>}, {transform_indices = @transform_1, window_bounds = array<i64: 1, 1, 16, 256>}, {transform_indices = @transform_2, window_bounds = array<i64: 1, 1, 16, 256>}, {pipeline_mode = #tpu.pipeline_mode<synchronous>, transform_indices = @transform_3, window_bounds = array<i64: 9, 16, 48>}, {pipeline_mode = #tpu.pipeline_mode<synchronous>, transform_indices = @transform_4, window_bounds = array<i64: 16, 1>}, {pipeline_mode = #tpu.pipeline_mode<synchronous>, transform_indices = @transform_5, window_bounds = array<i64: 1, 128>}, {transform_indices = @transform_6, window_bounds = array<i64: 1, 1, 16, 128>}, {transform_indices = @transform_7, window_bounds = array<i64: 1, 2, 128>}]} {
    %c0 = arith.constant 0 : index
    %c0_0 = arith.constant 0 : index
    %c0_1 = arith.constant 0 : index
    %c0_2 = arith.constant 0 : index
    %0 = vector.load %arg2[%c0, %c0_0, %c0_1, %c0_2] : memref<1x1x16x256xbf16, #tpu.memory_space<vmem>>, vector<1x1x16x256xbf16>
    %1 = vector.shape_cast %0 : vector<1x1x16x256xbf16> to vector<16x256xbf16>
    %c0_3 = arith.constant 0 : index
    %c0_4 = arith.constant 0 : index
    %c0_5 = arith.constant 0 : index
    %c0_6 = arith.constant 0 : index
    %2 = vector.load %arg3[%c0_3, %c0_4, %c0_5, %c0_6] : memref<1x1x16x256xbf16, #tpu.memory_space<vmem>>, vector<1x1x16x256xbf16>
    %3 = vector.shape_cast %2 : vector<1x1x16x256xbf16> to vector<16x256xbf16>
    %c0_7 = arith.constant 0 : index
    %c0_8 = arith.constant 0 : index
    %c0_9 = arith.constant 0 : index
    %c0_10 = arith.constant 0 : index
    %4 = vector.load %arg4[%c0_7, %c0_8, %c0_9, %c0_10] : memref<1x1x16x256xbf16, #tpu.memory_space<vmem>>, vector<1x1x16x256xbf16>
    %5 = vector.shape_cast %4 : vector<1x1x16x256xbf16> to vector<16x256xbf16>
    %6 = tpu.concatenate %1, %3, %5 in 0 : vector<16x256xbf16>, vector<16x256xbf16>, vector<16x256xbf16> -> vector<48x256xbf16>
    %c0_11 = arith.constant 0 : index
    %c0_12 = arith.constant 0 : index
    %c0_13 = arith.constant 0 : index
    %7 = vector.load %arg5[%c0_11, %c0_12, %c0_13] : memref<9x16x48xbf16, #tpu.memory_space<vmem>>, vector<1x16x48xbf16>
    %8 = vector.shape_cast %7 : vector<1x16x48xbf16> to vector<16x48xbf16>
    %9 = vector.extract_strided_slice %6 {offsets = [0, 0], sizes = [48, 128], strides = [1, 1]} : vector<48x256xbf16> to vector<48x128xbf16>
    %cst = arith.constant dense<0.000000e+00> : vector<16x128xf32>
    %10 = tpu.matmul %8, %9, %cst {dimension_numbers = #tpu.dot_dimension_numbers<[1], [0], [0], [1], [0, 0, 1, 1], [], []>} : vector<16x48xbf16>, vector<48x128xbf16>, vector<16x128xf32> -> vector<16x128xf32>
    %c1 = arith.constant 1 : index
    %c0_14 = arith.constant 0 : index
    %c0_15 = arith.constant 0 : index
    %11 = vector.load %arg5[%c1, %c0_14, %c0_15] : memref<9x16x48xbf16, #tpu.memory_space<vmem>>, vector<1x16x48xbf16>
    %12 = vector.shape_cast %11 : vector<1x16x48xbf16> to vector<16x48xbf16>
    %13 = vector.extract_strided_slice %6 {offsets = [0, 1], sizes = [48, 128], strides = [1, 1]} : vector<48x256xbf16> to vector<48x128xbf16>
    %cst_16 = arith.constant dense<0.000000e+00> : vector<16x128xf32>
    %14 = tpu.matmul %12, %13, %cst_16 {dimension_numbers = #tpu.dot_dimension_numbers<[1], [0], [0], [1], [0, 0, 1, 1], [], []>} : vector<16x48xbf16>, vector<48x128xbf16>, vector<16x128xf32> -> vector<16x128xf32>
    %15 = arith.addf %10, %14 : vector<16x128xf32>
    %c2 = arith.constant 2 : index
    %c0_17 = arith.constant 0 : index
    %c0_18 = arith.constant 0 : index
    %16 = vector.load %arg5[%c2, %c0_17, %c0_18] : memref<9x16x48xbf16, #tpu.memory_space<vmem>>, vector<1x16x48xbf16>
    %17 = vector.shape_cast %16 : vector<1x16x48xbf16> to vector<16x48xbf16>
    %18 = vector.extract_strided_slice %6 {offsets = [0, 2], sizes = [48, 128], strides = [1, 1]} : vector<48x256xbf16> to vector<48x128xbf16>
    %cst_19 = arith.constant dense<0.000000e+00> : vector<16x128xf32>
    %19 = tpu.matmul %17, %18, %cst_19 {dimension_numbers = #tpu.dot_dimension_numbers<[1], [0], [0], [1], [0, 0, 1, 1], [], []>} : vector<16x48xbf16>, vector<48x128xbf16>, vector<16x128xf32> -> vector<16x128xf32>
    %20 = arith.addf %15, %19 : vector<16x128xf32>
    %c3 = arith.constant 3 : index
    %c0_20 = arith.constant 0 : index
    %c0_21 = arith.constant 0 : index
    %21 = vector.load %arg5[%c3, %c0_20, %c0_21] : memref<9x16x48xbf16, #tpu.memory_space<vmem>>, vector<1x16x48xbf16>
    %22 = vector.shape_cast %21 : vector<1x16x48xbf16> to vector<16x48xbf16>
    %23 = vector.extract_strided_slice %6 {offsets = [0, 10], sizes = [48, 128], strides = [1, 1]} : vector<48x256xbf16> to vector<48x128xbf16>
    %cst_22 = arith.constant dense<0.000000e+00> : vector<16x128xf32>
    %24 = tpu.matmul %22, %23, %cst_22 {dimension_numbers = #tpu.dot_dimension_numbers<[1], [0], [0], [1], [0, 0, 1, 1], [], []>} : vector<16x48xbf16>, vector<48x128xbf16>, vector<16x128xf32> -> vector<16x128xf32>
    %25 = arith.addf %20, %24 : vector<16x128xf32>
    %c4 = arith.constant 4 : index
    %c0_23 = arith.constant 0 : index
    %c0_24 = arith.constant 0 : index
    %26 = vector.load %arg5[%c4, %c0_23, %c0_24] : memref<9x16x48xbf16, #tpu.memory_space<vmem>>, vector<1x16x48xbf16>
    %27 = vector.shape_cast %26 : vector<1x16x48xbf16> to vector<16x48xbf16>
    %28 = vector.extract_strided_slice %6 {offsets = [0, 11], sizes = [48, 128], strides = [1, 1]} : vector<48x256xbf16> to vector<48x128xbf16>
    %cst_25 = arith.constant dense<0.000000e+00> : vector<16x128xf32>
    %29 = tpu.matmul %27, %28, %cst_25 {dimension_numbers = #tpu.dot_dimension_numbers<[1], [0], [0], [1], [0, 0, 1, 1], [], []>} : vector<16x48xbf16>, vector<48x128xbf16>, vector<16x128xf32> -> vector<16x128xf32>
    %30 = arith.addf %25, %29 : vector<16x128xf32>
    %c5 = arith.constant 5 : index
    %c0_26 = arith.constant 0 : index
    %c0_27 = arith.constant 0 : index
    %31 = vector.load %arg5[%c5, %c0_26, %c0_27] : memref<9x16x48xbf16, #tpu.memory_space<vmem>>, vector<1x16x48xbf16>
    %32 = vector.shape_cast %31 : vector<1x16x48xbf16> to vector<16x48xbf16>
    %33 = vector.extract_strided_slice %6 {offsets = [0, 12], sizes = [48, 128], strides = [1, 1]} : vector<48x256xbf16> to vector<48x128xbf16>
    %cst_28 = arith.constant dense<0.000000e+00> : vector<16x128xf32>
    %34 = tpu.matmul %32, %33, %cst_28 {dimension_numbers = #tpu.dot_dimension_numbers<[1], [0], [0], [1], [0, 0, 1, 1], [], []>} : vector<16x48xbf16>, vector<48x128xbf16>, vector<16x128xf32> -> vector<16x128xf32>
    %35 = arith.addf %30, %34 : vector<16x128xf32>
    %c6 = arith.constant 6 : index
    %c0_29 = arith.constant 0 : index
    %c0_30 = arith.constant 0 : index
    %36 = vector.load %arg5[%c6, %c0_29, %c0_30] : memref<9x16x48xbf16, #tpu.memory_space<vmem>>, vector<1x16x48xbf16>
    %37 = vector.shape_cast %36 : vector<1x16x48xbf16> to vector<16x48xbf16>
    %38 = vector.extract_strided_slice %6 {offsets = [0, 20], sizes = [48, 128], strides = [1, 1]} : vector<48x256xbf16> to vector<48x128xbf16>
    %cst_31 = arith.constant dense<0.000000e+00> : vector<16x128xf32>
    %39 = tpu.matmul %37, %38, %cst_31 {dimension_numbers = #tpu.dot_dimension_numbers<[1], [0], [0], [1], [0, 0, 1, 1], [], []>} : vector<16x48xbf16>, vector<48x128xbf16>, vector<16x128xf32> -> vector<16x128xf32>
    %40 = arith.addf %35, %39 : vector<16x128xf32>
    %c7 = arith.constant 7 : index
    %c0_32 = arith.constant 0 : index
    %c0_33 = arith.constant 0 : index
    %41 = vector.load %arg5[%c7, %c0_32, %c0_33] : memref<9x16x48xbf16, #tpu.memory_space<vmem>>, vector<1x16x48xbf16>
    %42 = vector.shape_cast %41 : vector<1x16x48xbf16> to vector<16x48xbf16>
    %43 = vector.extract_strided_slice %6 {offsets = [0, 21], sizes = [48, 128], strides = [1, 1]} : vector<48x256xbf16> to vector<48x128xbf16>
    %cst_34 = arith.constant dense<0.000000e+00> : vector<16x128xf32>
    %44 = tpu.matmul %42, %43, %cst_34 {dimension_numbers = #tpu.dot_dimension_numbers<[1], [0], [0], [1], [0, 0, 1, 1], [], []>} : vector<16x48xbf16>, vector<48x128xbf16>, vector<16x128xf32> -> vector<16x128xf32>
    %45 = arith.addf %40, %44 : vector<16x128xf32>
    %c8 = arith.constant 8 : index
    %c0_35 = arith.constant 0 : index
    %c0_36 = arith.constant 0 : index
    %46 = vector.load %arg5[%c8, %c0_35, %c0_36] : memref<9x16x48xbf16, #tpu.memory_space<vmem>>, vector<1x16x48xbf16>
    %47 = vector.shape_cast %46 : vector<1x16x48xbf16> to vector<16x48xbf16>
    %48 = vector.extract_strided_slice %6 {offsets = [0, 22], sizes = [48, 128], strides = [1, 1]} : vector<48x256xbf16> to vector<48x128xbf16>
    %cst_37 = arith.constant dense<0.000000e+00> : vector<16x128xf32>
    %49 = tpu.matmul %47, %48, %cst_37 {dimension_numbers = #tpu.dot_dimension_numbers<[1], [0], [0], [1], [0, 0, 1, 1], [], []>} : vector<16x48xbf16>, vector<48x128xbf16>, vector<16x128xf32> -> vector<16x128xf32>
    %50 = arith.addf %45, %49 : vector<16x128xf32>
    %c0_38 = arith.constant 0 : index
    %c0_39 = arith.constant 0 : index
    %51 = vector.load %arg6[%c0_38, %c0_39] : memref<16x1xf32, #tpu.memory_space<vmem>>, vector<16x1xf32>
    %52 = vector.broadcast %51 : vector<16x1xf32> to vector<16x128xf32>
    %53 = arith.addf %50, %52 : vector<16x128xf32>
    %c0_40 = arith.constant 0 : index
    %c0_41 = arith.constant 0 : index
    %54 = vector.load %arg7[%c0_40, %c0_41] : memref<1x128xf32, #tpu.memory_space<vmem>>, vector<1x128xf32>
    %55 = vector.broadcast %54 : vector<1x128xf32> to vector<16x128xf32>
    %56 = arith.mulf %53, %55 : vector<16x128xf32>
    %57 = arith.truncf %56 : vector<16x128xf32> to vector<16x128xbf16>
    %c0_42 = arith.constant 0 : index
    %c0_43 = arith.constant 0 : index
    %c0_44 = arith.constant 0 : index
    %c0_45 = arith.constant 0 : index
    %58 = vector.load %arg8[%c0_42, %c0_43, %c0_44, %c0_45] : memref<1x1x16x128xbf16, #tpu.memory_space<vmem>>, vector<1x1x16x128xbf16>
    %59 = vector.shape_cast %58 : vector<1x1x16x128xbf16> to vector<16x128xbf16>
    %60 = vector.shape_cast %57 : vector<16x128xbf16> to vector<1x1x16x128xbf16>
    tpu.vector_store %arg8[%c0_42, %c0_43, %c0_44, %c0_45], %60 {strides = array<i32>} : memref<1x1x16x128xbf16, #tpu.memory_space<vmem>>, vector<1x1x16x128xbf16>,
    %c0_i32 = arith.constant 0 : i32
    %61 = arith.cmpi eq, %arg1, %c0_i32 : i32
    %62 = arith.extui %61 : i1 to i32
    %c0_i32_46 = arith.constant 0 : i32
    %63 = arith.cmpi ne, %62, %c0_i32_46 : i32
    scf.if %63 {
      %cst_60 = arith.constant 0.000000e+00 : f32
      %80 = vector.broadcast %cst_60 : f32 to vector<2x16x128xf32>
      %c0_61 = arith.constant 0 : index
      %c0_62 = arith.constant 0 : index
      %c0_63 = arith.constant 0 : index
      %81 = vector.load %arg10[%c0_61, %c0_62, %c0_63] : memref<2x16x128xf32, #tpu.memory_space<vmem>>, vector<2x16x128xf32>
      tpu.vector_store %arg10[%c0_61, %c0_62, %c0_63], %80 {strides = array<i32>} : memref<2x16x128xf32, #tpu.memory_space<vmem>>, vector<2x16x128xf32>,
    } else {
    }
    %c0_47 = arith.constant 0 : index
    %c0_48 = arith.constant 0 : index
    %c0_49 = arith.constant 0 : index
    %64 = vector.load %arg10[%c0_47, %c0_48, %c0_49] : memref<2x16x128xf32, #tpu.memory_space<vmem>>, vector<1x16x128xf32>
    %65 = vector.shape_cast %64 : vector<1x16x128xf32> to vector<16x128xf32>
    %66 = arith.addf %65, %56 : vector<16x128xf32>
    %c0_50 = arith.constant 0 : index
    %c0_51 = arith.constant 0 : index
    %c0_52 = arith.constant 0 : index
    %67 = vector.load %arg10[%c0_50, %c0_51, %c0_52] : memref<2x16x128xf32, #tpu.memory_space<vmem>>, vector<1x16x128xf32>
    %68 = vector.shape_cast %67 : vector<1x16x128xf32> to vector<16x128xf32>
    %69 = vector.shape_cast %66 : vector<16x128xf32> to vector<1x16x128xf32>
    tpu.vector_store %arg10[%c0_50, %c0_51, %c0_52], %69 {strides = array<i32>} : memref<2x16x128xf32, #tpu.memory_space<vmem>>, vector<1x16x128xf32>,
    %c1_53 = arith.constant 1 : index
    %c0_54 = arith.constant 0 : index
    %c0_55 = arith.constant 0 : index
    %70 = vector.load %arg10[%c1_53, %c0_54, %c0_55] : memref<2x16x128xf32, #tpu.memory_space<vmem>>, vector<1x16x128xf32>
    %71 = vector.shape_cast %70 : vector<1x16x128xf32> to vector<16x128xf32>
    %72 = arith.mulf %56, %56 : vector<16x128xf32>
    %73 = arith.addf %71, %72 : vector<16x128xf32>
    %c1_56 = arith.constant 1 : index
    %c0_57 = arith.constant 0 : index
    %c0_58 = arith.constant 0 : index
    %74 = vector.load %arg10[%c1_56, %c0_57, %c0_58] : memref<2x16x128xf32, #tpu.memory_space<vmem>>, vector<1x16x128xf32>
    %75 = vector.shape_cast %74 : vector<1x16x128xf32> to vector<16x128xf32>
    %76 = vector.shape_cast %73 : vector<16x128xf32> to vector<1x16x128xf32>
    tpu.vector_store %arg10[%c1_56, %c0_57, %c0_58], %76 {strides = array<i32>} : memref<2x16x128xf32, #tpu.memory_space<vmem>>, vector<1x16x128xf32>,
    %c3_i32 = arith.constant 3 : i32
    %77 = arith.cmpi eq, %arg1, %c3_i32 : i32
    %78 = arith.extui %77 : i1 to i32
    %c0_i32_59 = arith.constant 0 : i32
    %79 = arith.cmpi ne, %78, %c0_i32_59 : i32
    scf.if %79 {
      %c0_60 = arith.constant 0 : index
      %c0_61 = arith.constant 0 : index
      %c0_62 = arith.constant 0 : index
      %80 = vector.load %arg10[%c0_60, %c0_61, %c0_62] : memref<2x16x128xf32, #tpu.memory_space<vmem>>, vector<1x16x128xf32>
      %81 = vector.shape_cast %80 : vector<1x16x128xf32> to vector<16x128xf32>
      %82 = vector.shape_cast %81 : vector<16x128xf32> to vector<1x16x128xf32>
      %cst_63 = arith.constant dense<0.000000e+00> : vector<1xf32>
      %83 = vector.multi_reduction <add>, %82, %cst_63 [1, 2] : vector<1x16x128xf32> to vector<1xf32>
      %84 = vector.shape_cast %83 : vector<1xf32> to vector<1x1x1xf32>
      %85 = vector.extract %84[0, 0, 0] : f32 from vector<1x1x1xf32>
      %c1_64 = arith.constant 1 : index
      %c0_65 = arith.constant 0 : index
      %c0_66 = arith.constant 0 : index
      %86 = vector.load %arg10[%c1_64, %c0_65, %c0_66] : memref<2x16x128xf32, #tpu.memory_space<vmem>>, vector<1x16x128xf32>
      %87 = vector.shape_cast %86 : vector<1x16x128xf32> to vector<16x128xf32>
      %88 = vector.shape_cast %87 : vector<16x128xf32> to vector<1x16x128xf32>
      %cst_67 = arith.constant dense<0.000000e+00> : vector<1xf32>
      %89 = vector.multi_reduction <add>, %88, %cst_67 [1, 2] : vector<1x16x128xf32> to vector<1xf32>
      %90 = vector.shape_cast %89 : vector<1xf32> to vector<1x1x1xf32>
      %91 = vector.extract %90[0, 0, 0] : f32 from vector<1x1x1xf32>
      %cst_68 = arith.constant 2.048000e+03 : f32
      %92 = arith.divf %85, %cst_68 : f32
      %cst_69 = arith.constant 2.048000e+03 : f32
      %93 = arith.divf %91, %cst_69 : f32
      %94 = arith.mulf %92, %92 : f32
      %95 = arith.subf %93, %94 : f32
      %cst_70 = arith.constant 9.99999974E-6 : f32
      %96 = arith.addf %95, %cst_70 : f32
      %97 = math.rsqrt %96 : f32
      %98 = vector.broadcast %92 : f32 to vector<1x128xf32>
      %c0_71 = arith.constant 0 : index
      %c0_72 = arith.constant 0 : index
      %c0_73 = arith.constant 0 : index
      %99 = vector.load %arg9[%c0_71, %c0_72, %c0_73] : memref<1x2x128xf32, #tpu.memory_space<vmem>>, vector<1x1x128xf32>
      %100 = vector.shape_cast %99 : vector<1x1x128xf32> to vector<1x128xf32>
      %101 = vector.shape_cast %98 : vector<1x128xf32> to vector<1x1x128xf32>
      tpu.vector_store %arg9[%c0_71, %c0_72, %c0_73], %101 {strides = array<i32>} : memref<1x2x128xf32, #tpu.memory_space<vmem>>, vector<1x1x128xf32>,
      %102 = vector.broadcast %97 : f32 to vector<1x128xf32>
      %c0_74 = arith.constant 0 : index
      %c1_75 = arith.constant 1 : index
      %c0_76 = arith.constant 0 : index
      %103 = vector.load %arg9[%c0_74, %c1_75, %c0_76] : memref<1x2x128xf32, #tpu.memory_space<vmem>>, vector<1x1x128xf32>
      %104 = vector.shape_cast %103 : vector<1x1x128xf32> to vector<1x128xf32>
      %105 = vector.shape_cast %102 : vector<1x128xf32> to vector<1x1x128xf32>
      tpu.vector_store %arg9[%c0_74, %c1_75, %c0_76], %105 {strides = array<i32>} : memref<1x2x128xf32, #tpu.memory_space<vmem>>, vector<1x1x128xf32>,
    } else {
    }
    return
  }
  func.func @transform_0(%arg0: i32, %arg1: i32) -> (i32, i32, i32, i32) {
    %c0_i32 = arith.constant 0 : i32
    %c0_i32_0 = arith.constant 0 : i32
    %c0_i32_1 = arith.constant 0 : i32
    return %arg0, %arg1, %c0_i32, %c0_i32_0 : i32, i32, i32, i32
  }
  func.func @transform_1(%arg0: i32, %arg1: i32) -> (i32, i32, i32, i32) {
    %c1_i32 = arith.constant 1 : i32
    %0 = arith.addi %arg1, %c1_i32 : i32
    %c0_i32 = arith.constant 0 : i32
    %c0_i32_0 = arith.constant 0 : i32
    %c0_i32_1 = arith.constant 0 : i32
    return %arg0, %0, %c0_i32, %c0_i32_0 : i32, i32, i32, i32
  }
  func.func @transform_2(%arg0: i32, %arg1: i32) -> (i32, i32, i32, i32) {
    %c2_i32 = arith.constant 2 : i32
    %0 = arith.addi %arg1, %c2_i32 : i32
    %c0_i32 = arith.constant 0 : i32
    %c0_i32_0 = arith.constant 0 : i32
    %c0_i32_1 = arith.constant 0 : i32
    return %arg0, %0, %c0_i32, %c0_i32_0 : i32, i32, i32, i32
  }
  func.func @transform_3(%arg0: i32, %arg1: i32) -> (i32, i32, i32) {
    %c0_i32 = arith.constant 0 : i32
    %c0_i32_0 = arith.constant 0 : i32
    %c0_i32_1 = arith.constant 0 : i32
    %c0_i32_2 = arith.constant 0 : i32
    return %c0_i32, %c0_i32_0, %c0_i32_1 : i32, i32, i32
  }
  func.func @transform_4(%arg0: i32, %arg1: i32) -> (i32, i32) {
    %c0_i32 = arith.constant 0 : i32
    %c0_i32_0 = arith.constant 0 : i32
    %c0_i32_1 = arith.constant 0 : i32
    return %c0_i32, %c0_i32_0 : i32, i32
  }
  func.func @transform_5(%arg0: i32, %arg1: i32) -> (i32, i32) {
    %c0_i32 = arith.constant 0 : i32
    %c0_i32_0 = arith.constant 0 : i32
    %c0_i32_1 = arith.constant 0 : i32
    return %c0_i32, %c0_i32_0 : i32, i32
  }
  func.func @transform_6(%arg0: i32, %arg1: i32) -> (i32, i32, i32, i32) {
    %c0_i32 = arith.constant 0 : i32
    %c0_i32_0 = arith.constant 0 : i32
    %c0_i32_1 = arith.constant 0 : i32
    return %arg0, %arg1, %c0_i32, %c0_i32_0 : i32, i32, i32, i32
  }
  func.func @transform_7(%arg0: i32, %arg1: i32) -> (i32, i32, i32) {
    %c0_i32 = arith.constant 0 : i32
    %c0_i32_0 = arith.constant 0 : i32
    %c0_i32_1 = arith.constant 0 : i32
    return %arg0, %c0_i32, %c0_i32_0 : i32, i32, i32
  }
}

module attributes {stable_mosaic.version = 11 : i64} {
  func.func @kernel(%arg0: i32, %arg1: i32, %arg2: memref<1x1x16x256xbf16, #tpu.memory_space<vmem>>, %arg3: memref<1x1x16x256xbf16, #tpu.memory_space<vmem>>, %arg4: memref<1x1x16x256xbf16, #tpu.memory_space<vmem>>, %arg5: memref<9x16x48xbf16, #tpu.memory_space<vmem>>, %arg6: memref<16x1xf32, #tpu.memory_space<vmem>>, %arg7: memref<1x128xf32, #tpu.memory_space<vmem>>, %arg8: memref<1x1x16x256xbf16, #tpu.memory_space<vmem>>) attributes {dimension_semantics = [#tpu.dimension_semantics<parallel>, #tpu.dimension_semantics<parallel>], iteration_bounds = array<i64: 2, 6>, scalar_prefetch = 0 : i64, scratch_operands = 0 : i64, tpu.core_type = #tpu.core_type<tc>, window_params = [{transform_indices = @transform_0, window_bounds = array<i64: 1, 1, 16, 256>}, {transform_indices = @transform_1, window_bounds = array<i64: 1, 1, 16, 256>}, {transform_indices = @transform_2, window_bounds = array<i64: 1, 1, 16, 256>}, {pipeline_mode = #tpu.pipeline_mode<synchronous>, transform_indices = @transform_3, window_bounds = array<i64: 9, 16, 48>}, {pipeline_mode = #tpu.pipeline_mode<synchronous>, transform_indices = @transform_4, window_bounds = array<i64: 16, 1>}, {pipeline_mode = #tpu.pipeline_mode<synchronous>, transform_indices = @transform_5, window_bounds = array<i64: 1, 128>}, {transform_indices = @transform_6, window_bounds = array<i64: 1, 1, 16, 256>}]} {
    %c0_i32 = arith.constant 0 : i32
    %0 = arith.cmpi sgt, %arg1, %c0_i32 : i32
    %c5_i32 = arith.constant 5 : i32
    %1 = arith.cmpi slt, %arg1, %c5_i32 : i32
    %2 = arith.andi %0, %1 : i1
    %true = arith.constant true
    %3 = arith.xori %2, %true : i1
    %4 = arith.extui %3 : i1 to i32
    %c0_i32_0 = arith.constant 0 : i32
    %5 = arith.cmpi ne, %4, %c0_i32_0 : i32
    scf.if %5 {
      %cst = arith.constant 0.000000e+00 : bf16
      %8 = vector.broadcast %cst : bf16 to vector<16x256xbf16>
      %c0 = arith.constant 0 : index
      %c0_2 = arith.constant 0 : index
      %c0_3 = arith.constant 0 : index
      %c0_4 = arith.constant 0 : index
      %9 = vector.load %arg8[%c0, %c0_2, %c0_3, %c0_4] : memref<1x1x16x256xbf16, #tpu.memory_space<vmem>>, vector<1x1x16x256xbf16>
      %10 = vector.shape_cast %9 : vector<1x1x16x256xbf16> to vector<16x256xbf16>
      %11 = vector.shape_cast %8 : vector<16x256xbf16> to vector<1x1x16x256xbf16>
      tpu.vector_store %arg8[%c0, %c0_2, %c0_3, %c0_4], %11 {strides = array<i32>} : memref<1x1x16x256xbf16, #tpu.memory_space<vmem>>, vector<1x1x16x256xbf16>,
    } else {
    }
    %6 = arith.extui %2 : i1 to i32
    %c0_i32_1 = arith.constant 0 : i32
    %7 = arith.cmpi ne, %6, %c0_i32_1 : i32
    scf.if %7 {
      %c0 = arith.constant 0 : index
      %c0_2 = arith.constant 0 : index
      %c0_3 = arith.constant 0 : index
      %c0_4 = arith.constant 0 : index
      %8 = vector.load %arg2[%c0, %c0_2, %c0_3, %c0_4] : memref<1x1x16x256xbf16, #tpu.memory_space<vmem>>, vector<1x1x16x256xbf16>
      %9 = vector.shape_cast %8 : vector<1x1x16x256xbf16> to vector<16x256xbf16>
      %c0_5 = arith.constant 0 : index
      %c0_6 = arith.constant 0 : index
      %c0_7 = arith.constant 0 : index
      %c0_8 = arith.constant 0 : index
      %10 = vector.load %arg3[%c0_5, %c0_6, %c0_7, %c0_8] : memref<1x1x16x256xbf16, #tpu.memory_space<vmem>>, vector<1x1x16x256xbf16>
      %11 = vector.shape_cast %10 : vector<1x1x16x256xbf16> to vector<16x256xbf16>
      %c0_9 = arith.constant 0 : index
      %c0_10 = arith.constant 0 : index
      %c0_11 = arith.constant 0 : index
      %c0_12 = arith.constant 0 : index
      %12 = vector.load %arg4[%c0_9, %c0_10, %c0_11, %c0_12] : memref<1x1x16x256xbf16, #tpu.memory_space<vmem>>, vector<1x1x16x256xbf16>
      %13 = vector.shape_cast %12 : vector<1x1x16x256xbf16> to vector<16x256xbf16>
      %14 = tpu.concatenate %9, %11, %13 in 0 : vector<16x256xbf16>, vector<16x256xbf16>, vector<16x256xbf16> -> vector<48x256xbf16>
      %c0_13 = arith.constant 0 : index
      %c0_14 = arith.constant 0 : index
      %c0_15 = arith.constant 0 : index
      %15 = vector.load %arg5[%c0_13, %c0_14, %c0_15] : memref<9x16x48xbf16, #tpu.memory_space<vmem>>, vector<1x16x48xbf16>
      %16 = vector.shape_cast %15 : vector<1x16x48xbf16> to vector<16x48xbf16>
      %17 = vector.extract_strided_slice %14 {offsets = [0, 0], sizes = [48, 128], strides = [1, 1]} : vector<48x256xbf16> to vector<48x128xbf16>
      %cst = arith.constant dense<0.000000e+00> : vector<16x128xf32>
      %18 = tpu.matmul %16, %17, %cst {dimension_numbers = #tpu.dot_dimension_numbers<[1], [0], [0], [1], [0, 0, 1, 1], [], []>} : vector<16x48xbf16>, vector<48x128xbf16>, vector<16x128xf32> -> vector<16x128xf32>
      %c1 = arith.constant 1 : index
      %c0_16 = arith.constant 0 : index
      %c0_17 = arith.constant 0 : index
      %19 = vector.load %arg5[%c1, %c0_16, %c0_17] : memref<9x16x48xbf16, #tpu.memory_space<vmem>>, vector<1x16x48xbf16>
      %20 = vector.shape_cast %19 : vector<1x16x48xbf16> to vector<16x48xbf16>
      %21 = vector.extract_strided_slice %14 {offsets = [0, 1], sizes = [48, 128], strides = [1, 1]} : vector<48x256xbf16> to vector<48x128xbf16>
      %cst_18 = arith.constant dense<0.000000e+00> : vector<16x128xf32>
      %22 = tpu.matmul %20, %21, %cst_18 {dimension_numbers = #tpu.dot_dimension_numbers<[1], [0], [0], [1], [0, 0, 1, 1], [], []>} : vector<16x48xbf16>, vector<48x128xbf16>, vector<16x128xf32> -> vector<16x128xf32>
      %23 = arith.addf %18, %22 : vector<16x128xf32>
      %c2 = arith.constant 2 : index
      %c0_19 = arith.constant 0 : index
      %c0_20 = arith.constant 0 : index
      %24 = vector.load %arg5[%c2, %c0_19, %c0_20] : memref<9x16x48xbf16, #tpu.memory_space<vmem>>, vector<1x16x48xbf16>
      %25 = vector.shape_cast %24 : vector<1x16x48xbf16> to vector<16x48xbf16>
      %26 = vector.extract_strided_slice %14 {offsets = [0, 2], sizes = [48, 128], strides = [1, 1]} : vector<48x256xbf16> to vector<48x128xbf16>
      %cst_21 = arith.constant dense<0.000000e+00> : vector<16x128xf32>
      %27 = tpu.matmul %25, %26, %cst_21 {dimension_numbers = #tpu.dot_dimension_numbers<[1], [0], [0], [1], [0, 0, 1, 1], [], []>} : vector<16x48xbf16>, vector<48x128xbf16>, vector<16x128xf32> -> vector<16x128xf32>
      %28 = arith.addf %23, %27 : vector<16x128xf32>
      %c3 = arith.constant 3 : index
      %c0_22 = arith.constant 0 : index
      %c0_23 = arith.constant 0 : index
      %29 = vector.load %arg5[%c3, %c0_22, %c0_23] : memref<9x16x48xbf16, #tpu.memory_space<vmem>>, vector<1x16x48xbf16>
      %30 = vector.shape_cast %29 : vector<1x16x48xbf16> to vector<16x48xbf16>
      %31 = vector.extract_strided_slice %14 {offsets = [0, 10], sizes = [48, 128], strides = [1, 1]} : vector<48x256xbf16> to vector<48x128xbf16>
      %cst_24 = arith.constant dense<0.000000e+00> : vector<16x128xf32>
      %32 = tpu.matmul %30, %31, %cst_24 {dimension_numbers = #tpu.dot_dimension_numbers<[1], [0], [0], [1], [0, 0, 1, 1], [], []>} : vector<16x48xbf16>, vector<48x128xbf16>, vector<16x128xf32> -> vector<16x128xf32>
      %33 = arith.addf %28, %32 : vector<16x128xf32>
      %c4 = arith.constant 4 : index
      %c0_25 = arith.constant 0 : index
      %c0_26 = arith.constant 0 : index
      %34 = vector.load %arg5[%c4, %c0_25, %c0_26] : memref<9x16x48xbf16, #tpu.memory_space<vmem>>, vector<1x16x48xbf16>
      %35 = vector.shape_cast %34 : vector<1x16x48xbf16> to vector<16x48xbf16>
      %36 = vector.extract_strided_slice %14 {offsets = [0, 11], sizes = [48, 128], strides = [1, 1]} : vector<48x256xbf16> to vector<48x128xbf16>
      %cst_27 = arith.constant dense<0.000000e+00> : vector<16x128xf32>
      %37 = tpu.matmul %35, %36, %cst_27 {dimension_numbers = #tpu.dot_dimension_numbers<[1], [0], [0], [1], [0, 0, 1, 1], [], []>} : vector<16x48xbf16>, vector<48x128xbf16>, vector<16x128xf32> -> vector<16x128xf32>
      %38 = arith.addf %33, %37 : vector<16x128xf32>
      %c5 = arith.constant 5 : index
      %c0_28 = arith.constant 0 : index
      %c0_29 = arith.constant 0 : index
      %39 = vector.load %arg5[%c5, %c0_28, %c0_29] : memref<9x16x48xbf16, #tpu.memory_space<vmem>>, vector<1x16x48xbf16>
      %40 = vector.shape_cast %39 : vector<1x16x48xbf16> to vector<16x48xbf16>
      %41 = vector.extract_strided_slice %14 {offsets = [0, 12], sizes = [48, 128], strides = [1, 1]} : vector<48x256xbf16> to vector<48x128xbf16>
      %cst_30 = arith.constant dense<0.000000e+00> : vector<16x128xf32>
      %42 = tpu.matmul %40, %41, %cst_30 {dimension_numbers = #tpu.dot_dimension_numbers<[1], [0], [0], [1], [0, 0, 1, 1], [], []>} : vector<16x48xbf16>, vector<48x128xbf16>, vector<16x128xf32> -> vector<16x128xf32>
      %43 = arith.addf %38, %42 : vector<16x128xf32>
      %c6 = arith.constant 6 : index
      %c0_31 = arith.constant 0 : index
      %c0_32 = arith.constant 0 : index
      %44 = vector.load %arg5[%c6, %c0_31, %c0_32] : memref<9x16x48xbf16, #tpu.memory_space<vmem>>, vector<1x16x48xbf16>
      %45 = vector.shape_cast %44 : vector<1x16x48xbf16> to vector<16x48xbf16>
      %46 = vector.extract_strided_slice %14 {offsets = [0, 20], sizes = [48, 128], strides = [1, 1]} : vector<48x256xbf16> to vector<48x128xbf16>
      %cst_33 = arith.constant dense<0.000000e+00> : vector<16x128xf32>
      %47 = tpu.matmul %45, %46, %cst_33 {dimension_numbers = #tpu.dot_dimension_numbers<[1], [0], [0], [1], [0, 0, 1, 1], [], []>} : vector<16x48xbf16>, vector<48x128xbf16>, vector<16x128xf32> -> vector<16x128xf32>
      %48 = arith.addf %43, %47 : vector<16x128xf32>
      %c7 = arith.constant 7 : index
      %c0_34 = arith.constant 0 : index
      %c0_35 = arith.constant 0 : index
      %49 = vector.load %arg5[%c7, %c0_34, %c0_35] : memref<9x16x48xbf16, #tpu.memory_space<vmem>>, vector<1x16x48xbf16>
      %50 = vector.shape_cast %49 : vector<1x16x48xbf16> to vector<16x48xbf16>
      %51 = vector.extract_strided_slice %14 {offsets = [0, 21], sizes = [48, 128], strides = [1, 1]} : vector<48x256xbf16> to vector<48x128xbf16>
      %cst_36 = arith.constant dense<0.000000e+00> : vector<16x128xf32>
      %52 = tpu.matmul %50, %51, %cst_36 {dimension_numbers = #tpu.dot_dimension_numbers<[1], [0], [0], [1], [0, 0, 1, 1], [], []>} : vector<16x48xbf16>, vector<48x128xbf16>, vector<16x128xf32> -> vector<16x128xf32>
      %53 = arith.addf %48, %52 : vector<16x128xf32>
      %c8 = arith.constant 8 : index
      %c0_37 = arith.constant 0 : index
      %c0_38 = arith.constant 0 : index
      %54 = vector.load %arg5[%c8, %c0_37, %c0_38] : memref<9x16x48xbf16, #tpu.memory_space<vmem>>, vector<1x16x48xbf16>
      %55 = vector.shape_cast %54 : vector<1x16x48xbf16> to vector<16x48xbf16>
      %56 = vector.extract_strided_slice %14 {offsets = [0, 22], sizes = [48, 128], strides = [1, 1]} : vector<48x256xbf16> to vector<48x128xbf16>
      %cst_39 = arith.constant dense<0.000000e+00> : vector<16x128xf32>
      %57 = tpu.matmul %55, %56, %cst_39 {dimension_numbers = #tpu.dot_dimension_numbers<[1], [0], [0], [1], [0, 0, 1, 1], [], []>} : vector<16x48xbf16>, vector<48x128xbf16>, vector<16x128xf32> -> vector<16x128xf32>
      %58 = arith.addf %53, %57 : vector<16x128xf32>
      %c0_40 = arith.constant 0 : index
      %c0_41 = arith.constant 0 : index
      %59 = vector.load %arg6[%c0_40, %c0_41] : memref<16x1xf32, #tpu.memory_space<vmem>>, vector<16x1xf32>
      %60 = vector.broadcast %59 : vector<16x1xf32> to vector<16x128xf32>
      %61 = arith.addf %58, %60 : vector<16x128xf32>
      %c0_42 = arith.constant 0 : index
      %c0_43 = arith.constant 0 : index
      %62 = vector.load %arg7[%c0_42, %c0_43] : memref<1x128xf32, #tpu.memory_space<vmem>>, vector<1x128xf32>
      %63 = vector.broadcast %62 : vector<1x128xf32> to vector<16x128xf32>
      %64 = arith.mulf %61, %63 : vector<16x128xf32>
      %65 = arith.truncf %64 : vector<16x128xf32> to vector<16x128xbf16>
      %cst_44 = arith.constant 0.000000e+00 : bf16
      %66 = vector.broadcast %cst_44 : bf16 to vector<16x11xbf16>
      %cst_45 = arith.constant 0.000000e+00 : bf16
      %67 = vector.broadcast %cst_45 : bf16 to vector<16x117xbf16>
      %68 = tpu.concatenate %66, %65, %67 in 1 : vector<16x11xbf16>, vector<16x128xbf16>, vector<16x117xbf16> -> vector<16x256xbf16>
      %c0_46 = arith.constant 0 : index
      %c0_47 = arith.constant 0 : index
      %c0_48 = arith.constant 0 : index
      %c0_49 = arith.constant 0 : index
      %69 = vector.load %arg8[%c0_46, %c0_47, %c0_48, %c0_49] : memref<1x1x16x256xbf16, #tpu.memory_space<vmem>>, vector<1x1x16x256xbf16>
      %70 = vector.shape_cast %69 : vector<1x1x16x256xbf16> to vector<16x256xbf16>
      %71 = vector.shape_cast %68 : vector<16x256xbf16> to vector<1x1x16x256xbf16>
      tpu.vector_store %arg8[%c0_46, %c0_47, %c0_48, %c0_49], %71 {strides = array<i32>} : memref<1x1x16x256xbf16, #tpu.memory_space<vmem>>, vector<1x1x16x256xbf16>,
    } else {
    }
    return
  }
  func.func @transform_0(%arg0: i32, %arg1: i32) -> (i32, i32, i32, i32) {
    %c1_i32 = arith.constant 1 : i32
    %0 = arith.subi %arg1, %c1_i32 : i32
    %c0_i32 = arith.constant 0 : i32
    %1 = arith.maxsi %0, %c0_i32 : i32
    %c0_i32_0 = arith.constant 0 : i32
    %c0_i32_1 = arith.constant 0 : i32
    %c0_i32_2 = arith.constant 0 : i32
    return %arg0, %1, %c0_i32_0, %c0_i32_1 : i32, i32, i32, i32
  }
  func.func @transform_1(%arg0: i32, %arg1: i32) -> (i32, i32, i32, i32) {
    %c0_i32 = arith.constant 0 : i32
    %c0_i32_0 = arith.constant 0 : i32
    %c0_i32_1 = arith.constant 0 : i32
    return %arg0, %arg1, %c0_i32, %c0_i32_0 : i32, i32, i32, i32
  }
  func.func @transform_2(%arg0: i32, %arg1: i32) -> (i32, i32, i32, i32) {
    %c1_i32 = arith.constant 1 : i32
    %0 = arith.addi %arg1, %c1_i32 : i32
    %c5_i32 = arith.constant 5 : i32
    %1 = arith.minsi %0, %c5_i32 : i32
    %c0_i32 = arith.constant 0 : i32
    %c0_i32_0 = arith.constant 0 : i32
    %c0_i32_1 = arith.constant 0 : i32
    return %arg0, %1, %c0_i32, %c0_i32_0 : i32, i32, i32, i32
  }
  func.func @transform_3(%arg0: i32, %arg1: i32) -> (i32, i32, i32) {
    %c0_i32 = arith.constant 0 : i32
    %c0_i32_0 = arith.constant 0 : i32
    %c0_i32_1 = arith.constant 0 : i32
    %c0_i32_2 = arith.constant 0 : i32
    return %c0_i32, %c0_i32_0, %c0_i32_1 : i32, i32, i32
  }
  func.func @transform_4(%arg0: i32, %arg1: i32) -> (i32, i32) {
    %c0_i32 = arith.constant 0 : i32
    %c0_i32_0 = arith.constant 0 : i32
    %c0_i32_1 = arith.constant 0 : i32
    return %c0_i32, %c0_i32_0 : i32, i32
  }
  func.func @transform_5(%arg0: i32, %arg1: i32) -> (i32, i32) {
    %c0_i32 = arith.constant 0 : i32
    %c0_i32_0 = arith.constant 0 : i32
    %c0_i32_1 = arith.constant 0 : i32
    return %c0_i32, %c0_i32_0 : i32, i32
  }
  func.func @transform_6(%arg0: i32, %arg1: i32) -> (i32, i32, i32, i32) {
    %c0_i32 = arith.constant 0 : i32
    %c0_i32_0 = arith.constant 0 : i32
    %c0_i32_1 = arith.constant 0 : i32
    return %arg0, %arg1, %c0_i32, %c0_i32_0 : i32, i32, i32, i32
  }
}

module attributes {stable_mosaic.version = 11 : i64} {
  func.func @_gn_apply_kernel(%arg0: i32, %arg1: i32, %arg2: memref<1x1x16x128xbf16, #tpu.memory_space<vmem>>, %arg3: memref<1x2x128xf32, #tpu.memory_space<vmem>>, %arg4: memref<16x1xf32, #tpu.memory_space<vmem>>, %arg5: memref<16x1xf32, #tpu.memory_space<vmem>>, %arg6: memref<1x1x16x128xf32, #tpu.memory_space<vmem>>) attributes {dimension_semantics = [#tpu.dimension_semantics<parallel>, #tpu.dimension_semantics<parallel>], iteration_bounds = array<i64: 2, 4>, scalar_prefetch = 0 : i64, scratch_operands = 0 : i64, tpu.core_type = #tpu.core_type<tc>, window_params = [{transform_indices = @transform_0, window_bounds = array<i64: 1, 1, 16, 128>}, {transform_indices = @transform_1, window_bounds = array<i64: 1, 2, 128>}, {pipeline_mode = #tpu.pipeline_mode<synchronous>, transform_indices = @transform_2, window_bounds = array<i64: 16, 1>}, {pipeline_mode = #tpu.pipeline_mode<synchronous>, transform_indices = @transform_3, window_bounds = array<i64: 16, 1>}, {transform_indices = @transform_4, window_bounds = array<i64: 1, 1, 16, 128>}]} {
    %c0 = arith.constant 0 : index
    %c0_0 = arith.constant 0 : index
    %c0_1 = arith.constant 0 : index
    %0 = vector.load %arg3[%c0, %c0_0, %c0_1] : memref<1x2x128xf32, #tpu.memory_space<vmem>>, vector<1x1x1xf32>
    %1 = vector.shape_cast %0 : vector<1x1x1xf32> to vector<1x1xf32>
    %c0_2 = arith.constant 0 : index
    %c1 = arith.constant 1 : index
    %c0_3 = arith.constant 0 : index
    %2 = vector.load %arg3[%c0_2, %c1, %c0_3] : memref<1x2x128xf32, #tpu.memory_space<vmem>>, vector<1x1x1xf32>
    %3 = vector.shape_cast %2 : vector<1x1x1xf32> to vector<1x1xf32>
    %c0_4 = arith.constant 0 : index
    %c0_5 = arith.constant 0 : index
    %4 = vector.load %arg4[%c0_4, %c0_5] : memref<16x1xf32, #tpu.memory_space<vmem>>, vector<16x1xf32>
    %5 = vector.broadcast %3 : vector<1x1xf32> to vector<16x1xf32>
    %6 = arith.mulf %5, %4 : vector<16x1xf32>
    %c0_6 = arith.constant 0 : index
    %c0_7 = arith.constant 0 : index
    %7 = vector.load %arg5[%c0_6, %c0_7] : memref<16x1xf32, #tpu.memory_space<vmem>>, vector<16x1xf32>
    %8 = vector.broadcast %1 : vector<1x1xf32> to vector<16x1xf32>
    %9 = arith.mulf %8, %6 : vector<16x1xf32>
    %10 = arith.subf %7, %9 : vector<16x1xf32>
    %c0_8 = arith.constant 0 : index
    %c0_9 = arith.constant 0 : index
    %c0_10 = arith.constant 0 : index
    %c0_11 = arith.constant 0 : index
    %11 = vector.load %arg2[%c0_8, %c0_9, %c0_10, %c0_11] : memref<1x1x16x128xbf16, #tpu.memory_space<vmem>>, vector<1x1x16x128xbf16>
    %12 = vector.shape_cast %11 : vector<1x1x16x128xbf16> to vector<16x128xbf16>
    %13 = arith.extf %12 : vector<16x128xbf16> to vector<16x128xf32>
    %14 = vector.broadcast %6 : vector<16x1xf32> to vector<16x128xf32>
    %15 = arith.mulf %13, %14 : vector<16x128xf32>
    %16 = vector.broadcast %10 : vector<16x1xf32> to vector<16x128xf32>
    %17 = arith.addf %15, %16 : vector<16x128xf32>
    %cst = arith.constant 0.000000e+00 : f32
    %18 = vector.broadcast %cst : f32 to vector<16x128xf32>
    %19 = arith.cmpf ogt, %17, %18 : vector<16x128xf32>
    %cst_12 = arith.constant 2.000000e-01 : f32
    %20 = vector.broadcast %cst_12 : f32 to vector<16x128xf32>
    %21 = arith.mulf %20, %17 : vector<16x128xf32>
    %22 = arith.select %19, %17, %21 : vector<16x128xi1>, vector<16x128xf32>
    %c0_13 = arith.constant 0 : index
    %c0_14 = arith.constant 0 : index
    %c0_15 = arith.constant 0 : index
    %c0_16 = arith.constant 0 : index
    %23 = vector.load %arg6[%c0_13, %c0_14, %c0_15, %c0_16] : memref<1x1x16x128xf32, #tpu.memory_space<vmem>>, vector<1x1x16x128xf32>
    %24 = vector.shape_cast %23 : vector<1x1x16x128xf32> to vector<16x128xf32>
    %25 = vector.shape_cast %22 : vector<16x128xf32> to vector<1x1x16x128xf32>
    tpu.vector_store %arg6[%c0_13, %c0_14, %c0_15, %c0_16], %25 {strides = array<i32>} : memref<1x1x16x128xf32, #tpu.memory_space<vmem>>, vector<1x1x16x128xf32>,
    return
  }
  func.func @transform_0(%arg0: i32, %arg1: i32) -> (i32, i32, i32, i32) {
    %c0_i32 = arith.constant 0 : i32
    %c0_i32_0 = arith.constant 0 : i32
    %c0_i32_1 = arith.constant 0 : i32
    return %arg0, %arg1, %c0_i32, %c0_i32_0 : i32, i32, i32, i32
  }
  func.func @transform_1(%arg0: i32, %arg1: i32) -> (i32, i32, i32) {
    %c0_i32 = arith.constant 0 : i32
    %c0_i32_0 = arith.constant 0 : i32
    %c0_i32_1 = arith.constant 0 : i32
    return %arg0, %c0_i32, %c0_i32_0 : i32, i32, i32
  }
  func.func @transform_2(%arg0: i32, %arg1: i32) -> (i32, i32) {
    %c0_i32 = arith.constant 0 : i32
    %c0_i32_0 = arith.constant 0 : i32
    %c0_i32_1 = arith.constant 0 : i32
    return %c0_i32, %c0_i32_0 : i32, i32
  }
  func.func @transform_3(%arg0: i32, %arg1: i32) -> (i32, i32) {
    %c0_i32 = arith.constant 0 : i32
    %c0_i32_0 = arith.constant 0 : i32
    %c0_i32_1 = arith.constant 0 : i32
    return %c0_i32, %c0_i32_0 : i32, i32
  }
  func.func @transform_4(%arg0: i32, %arg1: i32) -> (i32, i32, i32, i32) {
    %c0_i32 = arith.constant 0 : i32
    %c0_i32_0 = arith.constant 0 : i32
    %c0_i32_1 = arith.constant 0 : i32
    return %arg0, %arg1, %c0_i32, %c0_i32_0 : i32, i32, i32, i32
  }
}

</mosaic_0001>

<bundles_post_ra>
// kernel: a_call__.5
= control target key start
LH: loop header
LB: loop body
LE: loop exit
PB: predicated region body
PF: predicated region fallthrough
CT: control target
= control target key end

     0   :  { %s543_s15 = smov 0   ;;  %s545_s16 = smov 0   ;;  %s613_s0 = inlined_call_operand.vmem [shape: bf16[2,4,16,128], index: 0, kind: input, shape index: {}]   ;;  %s614_s1 = inlined_call_operand.vmem [shape: f32[2,2,128], index: 1, kind: input, shape index: {}]   ;;  %s615_s2 = inlined_call_operand.vmem [shape: f32[16,1], index: 2, kind: input, shape index: {}]   ;;  %s616_s3 = inlined_call_operand.vmem [shape: f32[16,1], index: 3, kind: input, shape index: {}]   ;;  %s617_s4 = inlined_call_operand.vmem [shape: f32[2,4,16,128], index: 4, kind: output, shape index: {}]  }
   0x1   :  { %s547_s17 = smov 0   ;;  %s549_s18 = smov 0  }
   0x2   :  { %s551_s19 = smov 0  }
   0x3 LB: > { %s23_s20 = sadd.s32 1, %s507_s17  ;;  %s26_s21 = sadd.s32 1, %s511_s18  ;;  %s515_s19 = sphi %s551_s19, %s14_s19   ;;  %s511_s18 = sphi %s549_s18, %s621_s18   ;;  %s507_s17 = sphi %s547_s17, %s620_s17   ;;  %s503_s16 = sphi %s545_s16, %s619_s16   ;;  %s499_s15 = sphi %s543_s15, %s618_s15  }
   0x4   : > { %p24_p0 = scmp.ge.s32.totalorder %s23_s20, 4  ;;  %p418_p1 = scmp.ge.s32.totalorder %s515_s19, 1 }
   0x5   : > { %p191_p2 = scmp.lt.s32.totalorder %s515_s19, 9 }
   0x6   : > { %s623_s20 = smov (%p24_p0, %s23_s20), 0  ;;  %s625_s21 = smov (!%p24_p0, %s26_s21), %s511_s18 }
   0x7   : > { %p192_p3 = pnand %p418_p1, %p191_p2  ;;  %p28_p4 = scmp.ge.s32.totalorder %s625_s21, 2 }
   0x8   : > { %p229_p5 = scmp.lt.s32.totalorder (!%p192_p3), %s503_s16, 1  ;;  %p231_p6 = scmp.lt.s32.totalorder (!%p192_p3), %s499_s15, 3 }
   0x9   : > { %s627_s21 = smov (%p28_p4, %s625_s21), 0  ;;  %195 = sbr.rel (%p192_p3) target bundleno = 158 (0x9e), region = 36 }
   0xe   : > { %v517_v0 = vmov 0   ;;  %s629_s16 = smov (!%p229_p5, %s503_s16), 1  ;;  %v253_v1 = vld [vmem:[%s615_s2] sm:$0xff]  ;;  %v254_v2 = vld [vmem:[%s615_s2 + $0x8] sm:$0xff]  ;;  %s631_s15 = smov (!%p231_p6, %s499_s15), 3 }
   0xf   : > { %475 = vset.pattern.permute.xlu0 %v517_v0  ;;  %476 = vset.pattern.permute.xlu1 %v517_v0  ;;  %s422_s22 = sshll.u32 %s629_s16, 1  ;;  %v261_v7 = vld [vmem:[%s616_s3] sm:$0xff]  ;;  %v262_v10 = vld [vmem:[%s616_s3 + $0x8] sm:$0xff]  ;;  %s419_s8 = sshll.u32 %s631_s15, 1 }
  0x10   : > { %s241_s29 = scalar_lea.vmem %s614_s1, %s422_s22  ;;  %s420_s9 = sshll.u32 %s629_s16, 3 }
  0x11   : > { %v426_v3 = vld [vmem:[%s241_s29 + $0x1] ss:$0 sm:$0xff]  ;;  %v427_v4 = vld [vmem:[%s241_s29] ss:$0 sm:$0xff]  ;;  %s235_s10 = sadd.s32 %s420_s9, %s419_s8 }
  0x12   : > { %v259_v5 = vmul.f32 %v426_v3, %v253_v1  ;;  %v260_v6 = vmul.f32 %v426_v3, %v254_v2  ;;  %s421_s11 = sshll.u32 %s235_s10, 2  ;;  %s425_s22 = sshll.u32 %s235_s10, 3 }
  0x13   : > { %s237_s14 = scalar_lea.vmem %s613_s0, %s421_s11  ;;  %s250_s15 = scalar_lea.vmem %s617_s4, %s425_s22 }
  0x14   : > { %277 = vperm.xlu0 %475, %v259_v5   ;;  %v267_v8 = vmul.f32 %v427_v4, %v259_v5  ;;  %v268_v9 = vmul.f32 %v427_v4, %v260_v6  ;;  %v431_v13 = vld [vmem:[%s237_s14] sm:$0xff]  }
  0x15   : > { %v432_v14 = vunpack.c.l.bf16 %v431_v13  ;;  %v433_v17 = vunpack.c.h.bf16 %v431_v13 }
  0x16   : > { %v269_v11 = vsub.f32 %v261_v7, %v267_v8  ;;  %v270_v12 = vsub.f32 %v262_v10, %v268_v9 }
  0x18   : > { %282 = vperm.xlu0 %475, %v260_v6   ;;  %289 = vperm.xlu1 %476, %v269_v11  }
  0x1c   : > { %294 = vperm.xlu1 %476, %v270_v12  }
  0x8f   : > { %v278_v15 = vpop.permute.xlu0 %277 }
  0x90   : > { %v285_v16 = vmul.f32 %v432_v14, %v278_v15 }
  0x93   : > { %v283_v18 = vpop.permute.xlu0 %282  ;;  %v290_v19 = vpop.permute.xlu1 %289 }
  0x94   : > { %v297_v20 = vadd.f32 %v290_v19, %v285_v16  ;;  %v286_v21 = vmul.f32 %v433_v17, %v283_v18 }
  0x96   : > { %vm299_vm0 = vcmp.gt.f32.partialorder %v297_v20, 0.0  ;;  %v301_v22 = vmul.f32 0.2, %v297_v20 }
  0x97   : > { %v295_v23 = vpop.permute.xlu1 %294 }
  0x98   : > { %v303_v24 = vsel %vm299_vm0, %v297_v20, %v301_v22  ;;  %v298_v25 = vadd.f32 %v295_v23, %v286_v21 }
  0x99   : > { %305 = vst [vmem:[%s250_s15] sm:$0xff] %v303_v24 }
  0x9a   : > { %vm300_vm1 = vcmp.gt.f32.partialorder %v298_v25, 0.0  ;;  %v302_v26 = vmul.f32 0.2, %v298_v25 }
  0x9c   : > { %v304_v27 = vsel %vm300_vm1, %v298_v25, %v302_v26 }
  0x9d   : > { %306 = vst [vmem:[%s250_s15 + $0x8] sm:$0xff] %v304_v27 }
  0x9e PF: > { %s14_s19 = sadd.s32 1, %s515_s19   ;;  %s618_s15 = smov %s507_s17 }
  0x9f   : > { %p11_p7 = scmp.ge.s32.totalorder %s14_s19, 10   ;;  %s619_s16 = smov %s511_s18 }
  0xa0   : > { %s620_s17 = smov %s623_s20  ;;  %s621_s18 = smov %s627_s21 }
  0xa1   :  { %13 = sbr.rel (!%p11_p7) target bundleno = 3 (0x3), region = 69 }

// kernel: a_call__.3
= control target key start
LH: loop header
LB: loop body
LE: loop exit
PB: predicated region body
PF: predicated region fallthrough
CT: control target
= control target key end

     0   :  { %s1617_s21 = smov 0   ;;  %s1619_s22 = smov 0   ;;  %s1873_s0 = inlined_call_operand.vmem [shape: bf16[2,6,16,256], index: 0, kind: input, shape index: {}, may-alias: {0,1,2}]   ;;  %s1874_s1 = inlined_call_operand.vmem [shape: bf16[2,6,16,256], index: 1, kind: input, shape index: {}, may-alias: {0,1,2}]   ;;  %s1875_s2 = inlined_call_operand.vmem [shape: bf16[2,6,16,256], index: 2, kind: input, shape index: {}, may-alias: {0,1,2}]   ;;  %s1876_s3 = inlined_call_operand.vmem [shape: bf16[9,16,48], index: 3, kind: input, shape index: {}]   ;;  %s1877_s4 = inlined_call_operand.vmem [shape: f32[16,1], index: 4, kind: input, shape index: {}]   ;;  %s1878_s5 = inlined_call_operand.vmem [shape: f32[1,128], index: 5, kind: input, shape index: {}]   ;;  %s1879_s6 = inlined_call_operand.vmem [shape: bf16[2,6,16,256], index: 6, kind: output, shape index: {}]  }
   0x1   :  { %s1621_s23 = smov 0   ;;  %s1623_s24 = smov 0  }
   0x2   :  { %s1625_s25 = smov 0  }
   0x3 LB: > { %s25_s26 = sadd.s32 1, %s1559_s23  ;;  %s28_s27 = sadd.s32 1, %s1563_s24  ;;  %s1567_s25 = sphi %s1625_s25, %s16_s25   ;;  %s1563_s24 = sphi %s1623_s24, %s1886_s24   ;;  %s1559_s23 = sphi %s1621_s23, %s1885_s23   ;;  %s1555_s22 = sphi %s1619_s22, %s1884_s22   ;;  %s1551_s21 = sphi %s1617_s21, %s1883_s21  }
   0x4   : > { %p26_p0 = scmp.ge.s32.totalorder %s25_s26, 6  ;;  %p1264_p1 = scmp.ge.s32.totalorder %s1567_s25, 1 }
   0x5   : > { %p288_p2 = scmp.lt.s32.totalorder %s1567_s25, 13 }
   0x6   : > { %s1888_s26 = smov (%p26_p0, %s25_s26), 0  ;;  %s1890_s27 = smov (!%p26_p0, %s28_s27), %s1563_s24 }
   0x7   : > { %p289_p3 = pnand %p1264_p1, %p288_p2  ;;  %p30_p4 = scmp.ge.s32.totalorder %s1890_s27, 2 }
   0x8   : > { %s1265_s28 = sadd.s32 (!%p289_p3), 4294967295, %s1551_s21  ;;  %p353_p5 = scmp.lt.s32.totalorder (!%p289_p3), %s1555_s22, 1 }
   0x9   : > { %s1892_s27 = smov (%p30_p4, %s1890_s27), 0  ;;  %292 = sbr.rel (%p289_p3) target bundleno = 571 (0x23b), region = 44 }
   0xa   : > { %1880 = sst [smem:[#allocation2_spill]] %s1892_s27  ;;  %p351_p6 = scmp.gt.s32.totalorder (!%p289_p3), %s1265_s28, 0 }
   0xb   : > { %p1266_p7 = scmp.lt.s32.totalorder (!%p289_p3), %s1265_s28, 5  ;;  %p367_p8 = scmp.lt.s32.totalorder (!%p289_p3), %s1551_s21, 5 }
   0xc   : > { %s374_s8 = sadd.s32 (!%p289_p3), 1, %s1551_s21  ;;  %p399_p10 = scmp.gt.s32.totalorder (!%p289_p3), %s1551_s21, 0 }
   0xd   : > { %p375_p9 = scmp.lt.s32.totalorder (!%p289_p3), %s374_s8, 5 }
   0xe   : > { %s1894_s22 = smov (!%p353_p5, %s1555_s22), 1  ;;  %s1896_s28 = smov (!%p351_p6, %s1265_s28), 0 }
   0xf   : > { %s1455_s29 = smul.u32 24, %s1894_s22  ;;  %s1898_s28 = smov (!%p1266_p7, %s1896_s28), 5 }
  0x10   : > { %s368_s30 = scalar_select %p367_p8, %s1551_s21, 5 }
  0x11   : > { %s1271_s7 = sshll.u32 %s1898_s28, 2  ;;  %s1900_s8 = smov (!%p375_p9, %s374_s8), 5 }
  0x12   : > { %s359_s9 = sadd.s32 %s1455_s29, %s1271_s7  ;;  %s1273_s10 = sshll.u32 %s368_s30, 2 }
  0x13   : > { %s1272_s11 = sshll.u32 %s359_s9, 2  ;;  %s371_s12 = sadd.s32 %s1455_s29, %s1273_s10 }
  0x14   : > { %s361_s15 = scalar_lea.vmem %s1873_s0, %s1272_s11  ;;  %s1274_s16 = sshll.u32 %s371_s12, 2 }
  0x15   : > { %s373_s19 = scalar_lea.vmem %s1874_s1, %s1274_s16  ;;  %s1664_s27 = scalar_lea.vmem %s1879_s6, %s1274_s16 }
  0x16   : > { %p1669_p11 = pnand %p399_p10, %p367_p8  ;;  %s1902_s8 = smov (!%p375_p9, %s1900_s8), 5 }
  0x17   : > { %s1278_s30 = sshll.u32 %s1902_s8, 2  ;;  %s1569_s21 = smov (!%p1669_p11), 127  }
  0x18   : > { %s383_s7 = sadd.s32 %s1455_s29, %s1278_s30  ;;  %404 = sbr.rel (%p1669_p11) target bundleno = 566 (0x236), region = 48 }
  0x19   : > { %s1279_s9 = sshll.u32 %s383_s7, 2  ;;  %s1572_s13 = smov (!%p1669_p11), 126  }
  0x1a   : > { %s385_s12 = scalar_lea.vmem %s1875_s2, %s1279_s9  ;;  %s1573_s14 = smov (!%p1669_p11), 118  }
  0x1b   : > { %s1575_s16 = smov (!%p1669_p11), 116   ;;  %s1576_s17 = smov (!%p1669_p11), 108  }
  0x1c   : > { %s1577_s18 = smov (!%p1669_p11), 107   ;;  %s1580_s9 = smov (!%p1669_p11), 11  }
  0x1d   : > { %v1678_v0 = vld [vmem:[%s385_s12] ss:$8 sps:$4 sm:$0xff]   ;;  %v1683_v2 = vld [vmem:[%s385_s12 + $0x4] ss:$8 sps:$4 sm:$0xff]   ;;  %v1570_v5 = vmov 0.0   ;;  %vm1571_vm0 = vmmov 0  }
  0x1e   : > { %v1680_v1 = vld [vmem:[%s373_s19] ss:$8 sps:$4 sm:$0xff]   ;;  %456 = vrot.lane.b32.xlu0 %v1678_v0, %s1569_s21  ;;  %v1686_v3 = vld [vmem:[%s373_s19 + $0x4] ss:$8 sps:$4 sm:$0xff]   ;;  %1365 = vmatprep.subr.bf16.mxu0 %v1570_v5  ;;  %vm467_vm1 = vcmask 392192   ;;  %s1578_s19 = smov 106  }
  0x1f   : > { %452 = vrot.lane.b32.xlu1 %v1680_v1, %s1569_s21  ;;  %v1688_v4 = vld [vmem:[%s361_s15 + $0x4] ss:$8 sps:$4 sm:$0xff]   ;;  %1375 = vmatprep.subr.bf16.mxu1 %v1570_v5  ;;  %v1693_v6 = vld [vmem:[%s361_s15] ss:$8 sps:$4 sm:$0xff]   ;;  %s1574_s15 = smov 117   ;;  %v1579_v8 = vmov 0  }
  0x20   : > { %1376 = vmatpush3.bf16.msra.mxu1 %v1678_v0  ;;  %1371 = vmatprep.mubr.msk.bf16.mxu0 %vm1571_vm0, %v1570_v5  ;;  %v1521_v7 = vld [vmem:[%s1876_s3] sm:$0xff]   ;;  %v1073_v10 = vld [vmem:[%s1877_s4 + $0x8] sm:$0xff]  ;;  %vm460_vm2 = vcmask 1039360   ;;  %vm581_vm3 = vcmask 1031168   ;;  %vm654_vm4 = vcmask 965632   ;;  %v1522_v32 = vld [vmem:[%s1876_s3 + $0x10] sm:$0xff]  }
  0x21   : > { %1377 = vmatprep.subr.bf16.mxu1 %v1570_v5  ;;  %1381 = vmatprep.mubr.msk.bf16.mxu1 %vm1571_vm0, %v1570_v5  ;;  %v1072_v9 = vld [vmem:[%s1877_s4] sm:$0xff]  ;;  %v1520_v22 = vld [vmem:[%s1876_s3 + $0x8] sm:$0xff]   ;;  %vm727_vm5 = vcmask 957440   ;;  %v1523_v46 = vld [vmem:[%s1876_s3 + $0x18] sm:$0xff]   ;;  %vm800_vm6 = vcmask 949248   ;;  %vm873_vm7 = vcmask 883712  }
  0x22   : > { %458 = vrot.lane.b32.xlu0 %v1683_v2, %s1569_s21  ;;  %1510 = vset.pattern.permute.xlu1 %v1579_v8  ;;  %v1524_v50 = vld [vmem:[%s1876_s3 + $0x20] sm:$0xff]   ;;  %vm946_vm8 = vcmask 875520   ;;  %vm1019_vm9 = vcmask 867328   ;;  %vm1099_vm10 = vcmask 89088  }
  0x23   : > { %454 = vrot.lane.b32.xlu1 %v1686_v3, %s1569_s21  ;;  %1509 = vset.pattern.permute.xlu0 %v1579_v8 }
  0x24   : > { %1378 = vmatpush3.bf16.msra.mxu1 %v1680_v1 }
  0x25   : > { %1379 = vmatprep.subr.bf16.mxu1 %v1570_v5 }
  0x26   : > { %448 = vrot.lane.b32.xlu0 %v1693_v6, %s1569_s21 }
  0x27   : > { %450 = vrot.lane.b32.xlu1 %v1688_v4, %s1569_s21 }
  0x28   : > { %1380 = vmatpush3.bf16.msra.mxu1 %v1693_v6 }
  0x29   : > { %1395 = vmatprep.subr.bf16.mxu1 %v1570_v5 }
  0x2a   : > { %577 = vrot.lane.b32.xlu0 %v1678_v0, %s1572_s13 }
  0x2b   : > { %579 = vrot.lane.b32.xlu1 %v1683_v2, %s1572_s13  ;;  %1382 = vmatmul.mubr.msk.bf16.vlgmr.msra.gmra.mxu1 %vm467_vm1, %v1521_v7  ;;  %v1526_v7 = vld [vmem:[%s1876_s3 + $0x30] sm:$0xff]  }
  0x2c   : > { %1401 = vmatprep.mubr.msk.bf16.mxu1 %vm1571_vm0, %v1570_v5 }
  0x2e   : > { %573 = vrot.lane.b32.xlu0 %v1680_v1, %s1572_s13 }
  0x2f   : > { %575 = vrot.lane.b32.xlu1 %v1686_v3, %s1572_s13 }
  0x32   : > { %569 = vrot.lane.b32.xlu0 %v1693_v6, %s1572_s13 }
  0x33   : > { %571 = vrot.lane.b32.xlu1 %v1688_v4, %s1572_s13 }
  0x36   : > { %650 = vrot.lane.b32.xlu0 %v1678_v0, %s1573_s14 }
  0x37   : > { %652 = vrot.lane.b32.xlu1 %v1683_v2, %s1573_s14 }
  0x3a   : > { %723 = vrot.lane.b32.xlu0 %v1678_v0, %s1574_s15 }
  0x3b   : > { %725 = vrot.lane.b32.xlu1 %v1683_v2, %s1574_s15 }
  0x3e   : > { %646 = vrot.lane.b32.xlu0 %v1680_v1, %s1573_s14 }
  0x3f   : > { %648 = vrot.lane.b32.xlu1 %v1686_v3, %s1573_s14 }
  0x42   : > { %719 = vrot.lane.b32.xlu0 %v1680_v1, %s1574_s15 }
  0x43   : > { %721 = vrot.lane.b32.xlu1 %v1686_v3, %s1574_s15 }
  0x46   : > { %642 = vrot.lane.b32.xlu0 %v1693_v6, %s1573_s14 }
  0x47   : > { %644 = vrot.lane.b32.xlu1 %v1688_v4, %s1573_s14 }
  0x4a   : > { %715 = vrot.lane.b32.xlu0 %v1693_v6, %s1574_s15 }
  0x4b   : > { %717 = vrot.lane.b32.xlu1 %v1688_v4, %s1574_s15 }
  0x4e   : > { %796 = vrot.lane.b32.xlu0 %v1678_v0, %s1575_s16 }
  0x4f   : > { %798 = vrot.lane.b32.xlu1 %v1683_v2, %s1575_s16 }
  0x52   : > { %869 = vrot.lane.b32.xlu0 %v1678_v0, %s1576_s17 }
  0x53   : > { %871 = vrot.lane.b32.xlu1 %v1683_v2, %s1576_s17 }
  0x56   : > { %792 = vrot.lane.b32.xlu0 %v1680_v1, %s1575_s16 }
  0x57   : > { %794 = vrot.lane.b32.xlu1 %v1686_v3, %s1575_s16 }
  0x5a   : > { %865 = vrot.lane.b32.xlu0 %v1680_v1, %s1576_s17 }
  0x5b   : > { %867 = vrot.lane.b32.xlu1 %v1686_v3, %s1576_s17 }
  0x5e   : > { %788 = vrot.lane.b32.xlu0 %v1693_v6, %s1575_s16 }
  0x5f   : > { %790 = vrot.lane.b32.xlu1 %v1688_v4, %s1575_s16 }
  0x62   : > { %861 = vrot.lane.b32.xlu0 %v1693_v6, %s1576_s17 }
  0x63   : > { %863 = vrot.lane.b32.xlu1 %v1688_v4, %s1576_s17 }
  0x66   : > { %942 = vrot.lane.b32.xlu0 %v1678_v0, %s1577_s18 }
  0x67   : > { %944 = vrot.lane.b32.xlu1 %v1683_v2, %s1577_s18 }
  0x6a   : > { %1015 = vrot.lane.b32.xlu0 %v1678_v0, %s1578_s19 }
  0x6b   : > { %1017 = vrot.lane.b32.xlu1 %v1683_v2, %s1578_s19  ;;  %v1525_v2 = vld [vmem:[%s1876_s3 + $0x28] sm:$0xff]  }
  0x6e   : > { %938 = vrot.lane.b32.xlu0 %v1680_v1, %s1577_s18 }
  0x6f   : > { %940 = vrot.lane.b32.xlu1 %v1686_v3, %s1577_s18 }
  0x72   : > { %1011 = vrot.lane.b32.xlu0 %v1680_v1, %s1578_s19 }
  0x73   : > { %1013 = vrot.lane.b32.xlu1 %v1686_v3, %s1578_s19 }
  0x76   : > { %934 = vrot.lane.b32.xlu0 %v1693_v6, %s1577_s18 }
  0x77   : > { %936 = vrot.lane.b32.xlu1 %v1688_v4, %s1577_s18 }
  0x7a   : > { %1007 = vrot.lane.b32.xlu0 %v1693_v6, %s1578_s19 }
  0x7b   : > { %1009 = vrot.lane.b32.xlu1 %v1688_v4, %s1578_s19 }
  0x7e   : > { %1076 = vperm.xlu0 %1509, %v1072_v9  }
  0x7f   : > { %1081 = vperm.xlu1 %1510, %v1073_v10  }
  0x90   : > { %v457_v11 = vpop.permute.xlu0 %456 }
  0x91   : > { %v453_v12 = vpop.permute.xlu1 %452 }
  0x94   : > { %v459_v13 = vpop.permute.xlu0 %458 }
  0x95   : > { %v455_v14 = vpop.permute.xlu1 %454  ;;  %v463_v15 = vsel %vm460_vm2, %v457_v11, %v459_v13 }
  0x96   : > { %1366 = vmatpush3.bf16.msra.mxu0 %v463_v15  ;;  %v462_v18 = vsel %vm460_vm2, %v453_v12, %v455_v14 }
  0x97   : > { %1367 = vmatprep.subr.bf16.mxu0 %v1570_v5 }
  0x98   : > { %v449_v16 = vpop.permute.xlu0 %448 }
  0x99   : > { %v451_v17 = vpop.permute.xlu1 %450 }
  0x9a   : > { %1368 = vmatpush3.bf16.msra.mxu0 %v462_v18  ;;  %v461_v21 = vsel %vm460_vm2, %v449_v16, %v451_v17 }
  0x9b   : > { %1369 = vmatprep.subr.bf16.mxu0 %v1570_v5 }
  0x9c   : > { %v578_v19 = vpop.permute.xlu0 %577 }
  0x9d   : > { %v580_v20 = vpop.permute.xlu1 %579 }
  0x9e   : > { %1370 = vmatpush3.bf16.msra.mxu0 %v461_v21  ;;  %v584_v24 = vsel %vm581_vm3, %v578_v19, %v580_v20 }
  0x9f   : > { %1385 = vmatprep.subr.bf16.mxu0 %v1570_v5 }
  0xa0   : > { %v574_v23 = vpop.permute.xlu0 %573 }
  0xa1   : > { %v576_v25 = vpop.permute.xlu1 %575  ;;  %1372 = vmatmul.mubr.msk.bf16.vlgmr.msra.gmra.mxu0 %vm467_vm1, %v1520_v22 }
  0xa2   : > { %1386 = vmatpush3.bf16.msra.mxu0 %v584_v24  ;;  %1391 = vmatprep.mubr.msk.bf16.mxu0 %vm1571_vm0, %v1570_v5  ;;  %v583_v27 = vsel %vm581_vm3, %v574_v23, %v576_v25  ;;  %v1527_v23 = vld [vmem:[%s1876_s3 + $0x38] sm:$0xff]  }
  0xa3   : > { %1387 = vmatprep.subr.bf16.mxu0 %v1570_v5 }
  0xa4   : > { %v570_v26 = vpop.permute.xlu0 %569 }
  0xa5   : > { %v572_v28 = vpop.permute.xlu1 %571 }
  0xa6   : > { %1388 = vmatpush3.bf16.msra.mxu0 %v583_v27  ;;  %v582_v30 = vsel %vm581_vm3, %v570_v26, %v572_v28  ;;  %v1528_v28 = vld [vmem:[%s1876_s3 + $0x40] sm:$0xff]  }
  0xa7   : > { %1389 = vmatprep.subr.bf16.mxu0 %v1570_v5 }
  0xa8   : > { %v651_v29 = vpop.permute.xlu0 %650 }
  0xa9   : > { %v653_v31 = vpop.permute.xlu1 %652 }
  0xaa   : > { %v657_v33 = vsel %vm654_vm4, %v651_v29, %v653_v31  ;;  %1390 = vmatpush3.bf16.msra.mxu0 %v582_v30 }
  0xab   : > { %1396 = vmatpush3.bf16.msra.mxu1 %v657_v33  ;;  %1405 = vmatprep.subr.bf16.mxu0 %v1570_v5 }
  0xac   : > { %v724_v34 = vpop.permute.xlu0 %723  ;;  %1397 = vmatprep.subr.bf16.mxu1 %v1570_v5 }
  0xad   : > { %v726_v35 = vpop.permute.xlu1 %725  ;;  %1392 = vmatmul.mubr.msk.bf16.vlgmr.msra.gmra.mxu0 %vm467_vm1, %v1522_v32 }
  0xae   : > { %v730_v36 = vsel %vm727_vm5, %v724_v34, %v726_v35  ;;  %1411 = vmatprep.mubr.msk.bf16.mxu0 %vm1571_vm0, %v1570_v5 }
  0xaf   : > { %1406 = vmatpush3.bf16.msra.mxu0 %v730_v36 }
  0xb0   : > { %v647_v37 = vpop.permute.xlu0 %646  ;;  %1407 = vmatprep.subr.bf16.mxu0 %v1570_v5 }
  0xb1   : > { %v649_v38 = vpop.permute.xlu1 %648 }
  0xb2   : > { %v656_v39 = vsel %vm654_vm4, %v647_v37, %v649_v38 }
  0xb3   : > { %1398 = vmatpush3.bf16.msra.mxu1 %v656_v39 }
  0xb4   : > { %v720_v40 = vpop.permute.xlu0 %719  ;;  %1399 = vmatprep.subr.bf16.mxu1 %v1570_v5 }
  0xb5   : > { %v722_v41 = vpop.permute.xlu1 %721 }
  0xb6   : > { %v729_v42 = vsel %vm727_vm5, %v720_v40, %v722_v41 }
  0xb7   : > { %1408 = vmatpush3.bf16.msra.mxu0 %v729_v42 }
  0xb8   : > { %v643_v43 = vpop.permute.xlu0 %642  ;;  %1409 = vmatprep.subr.bf16.mxu0 %v1570_v5 }
  0xb9   : > { %v645_v44 = vpop.permute.xlu1 %644 }
  0xba   : > { %v655_v45 = vsel %vm654_vm4, %v643_v43, %v645_v44 }
  0xbb   : > { %1400 = vmatpush3.bf16.msra.mxu1 %v655_v45 }
  0xbc   : > { %v716_v47 = vpop.permute.xlu0 %715  ;;  %1415 = vmatprep.subr.bf16.mxu1 %v1570_v5 }
  0xbd   : > { %v718_v48 = vpop.permute.xlu1 %717 }
  0xbe   : > { %v728_v49 = vsel %vm727_vm5, %v716_v47, %v718_v48  ;;  %1402 = vmatmul.mubr.msk.bf16.vlgmr.msra.gmra.mxu1 %vm467_vm1, %v1523_v46 }
  0xbf   : > { %1410 = vmatpush3.bf16.msra.mxu0 %v728_v49  ;;  %1421 = vmatprep.mubr.msk.bf16.mxu1 %vm1571_vm0, %v1570_v5 }
  0xc0   : > { %v797_v51 = vpop.permute.xlu0 %796  ;;  %1425 = vmatprep.subr.bf16.mxu0 %v1570_v5 }
  0xc1   : > { %v799_v52 = vpop.permute.xlu1 %798 }
  0xc2   : > { %v803_v53 = vsel %vm800_vm6, %v797_v51, %v799_v52  ;;  %1412 = vmatmul.mubr.msk.bf16.vlgmr.msra.gmra.mxu0 %vm467_vm1, %v1524_v50 }
  0xc3   : > { %1416 = vmatpush3.bf16.msra.mxu1 %v803_v53  ;;  %1431 = vmatprep.mubr.msk.bf16.mxu0 %vm1571_vm0, %v1570_v5 }
  0xc4   : > { %v870_v54 = vpop.permute.xlu0 %869  ;;  %1417 = vmatprep.subr.bf16.mxu1 %v1570_v5 }
  0xc5   : > { %v872_v55 = vpop.permute.xlu1 %871 }
  0xc6   : > { %v876_v56 = vsel %vm873_vm7, %v870_v54, %v872_v55 }
  0xc7   : > { %1426 = vmatpush3.bf16.msra.mxu0 %v876_v56 }
  0xc8   : > { %v793_v57 = vpop.permute.xlu0 %792  ;;  %1427 = vmatprep.subr.bf16.mxu0 %v1570_v5 }
  0xc9   : > { %v795_v58 = vpop.permute.xlu1 %794 }
  0xca   : > { %v802_v59 = vsel %vm800_vm6, %v793_v57, %v795_v58 }
  0xcb   : > { %1418 = vmatpush3.bf16.msra.mxu1 %v802_v59 }
  0xcc   : > { %v866_v60 = vpop.permute.xlu0 %865  ;;  %1419 = vmatprep.subr.bf16.mxu1 %v1570_v5 }
  0xcd   : > { %v868_v61 = vpop.permute.xlu1 %867 }
  0xce   : > { %v875_v62 = vsel %vm873_vm7, %v866_v60, %v868_v61 }
  0xcf   : > { %1428 = vmatpush3.bf16.msra.mxu0 %v875_v62 }
  0xd0   : > { %v789_v63 = vpop.permute.xlu0 %788  ;;  %1429 = vmatprep.subr.bf16.mxu0 %v1570_v5 }
  0xd1   : > { %v791_v0 = vpop.permute.xlu1 %790 }
  0xd2   : > { %v801_v1 = vsel %vm800_vm6, %v789_v63, %v791_v0 }
  0xd3   : > { %1420 = vmatpush3.bf16.msra.mxu1 %v801_v1 }
  0xd4   : > { %v862_v3 = vpop.permute.xlu0 %861  ;;  %1435 = vmatprep.subr.bf16.mxu1 %v1570_v5 }
  0xd5   : > { %v864_v4 = vpop.permute.xlu1 %863 }
  0xd6   : > { %v874_v6 = vsel %vm873_vm7, %v862_v3, %v864_v4  ;;  %1422 = vmatmul.mubr.msk.bf16.vlgmr.msra.gmra.mxu1 %vm467_vm1, %v1525_v2 }
  0xd7   : > { %1430 = vmatpush3.bf16.msra.mxu0 %v874_v6  ;;  %1441 = vmatprep.mubr.msk.bf16.mxu1 %vm1571_vm0, %v1570_v5 }
  0xd8   : > { %v943_v8 = vpop.permute.xlu0 %942  ;;  %1445 = vmatprep.subr.bf16.mxu0 %v1570_v5 }
  0xd9   : > { %v945_v9 = vpop.permute.xlu1 %944 }
  0xda   : > { %v949_v10 = vsel %vm946_vm8, %v943_v8, %v945_v9  ;;  %1432 = vmatmul.mubr.msk.bf16.vlgmr.msra.gmra.mxu0 %vm467_vm1, %v1526_v7 }
  0xdb   : > { %1436 = vmatpush3.bf16.msra.mxu1 %v949_v10  ;;  %1451 = vmatprep.mubr.msk.bf16.mxu0 %vm1571_vm0, %v1570_v5 }
  0xdc   : > { %v1016_v11 = vpop.permute.xlu0 %1015  ;;  %1437 = vmatprep.subr.bf16.mxu1 %v1570_v5 }
  0xdd   : > { %v1018_v12 = vpop.permute.xlu1 %1017 }
  0xde   : > { %v1022_v13 = vsel %vm1019_vm9, %v1016_v11, %v1018_v12 }
  0xdf   : > { %1446 = vmatpush3.bf16.msra.mxu0 %v1022_v13 }
  0xe0   : > { %v939_v14 = vpop.permute.xlu0 %938  ;;  %1447 = vmatprep.subr.bf16.mxu0 %v1570_v5 }
  0xe1   : > { %v941_v15 = vpop.permute.xlu1 %940 }
  0xe2   : > { %v948_v16 = vsel %vm946_vm8, %v939_v14, %v941_v15 }
  0xe3   : > { %1438 = vmatpush3.bf16.msra.mxu1 %v948_v16 }
  0xe4   : > { %v1012_v17 = vpop.permute.xlu0 %1011  ;;  %1439 = vmatprep.subr.bf16.mxu1 %v1570_v5 }
  0xe5   : > { %v1014_v18 = vpop.permute.xlu1 %1013 }
  0xe6   : > { %v1021_v19 = vsel %vm1019_vm9, %v1012_v17, %v1014_v18  ;;  %v1322_v18 = vld [vmem:[%s1878_s5] ss:$0 sm:$0xff] }
  0xe7   : > { %1448 = vmatpush3.bf16.msra.mxu0 %v1021_v19 }
  0xe8   : > { %v935_v20 = vpop.permute.xlu0 %934  ;;  %1449 = vmatprep.subr.bf16.mxu0 %v1570_v5 }
  0xe9   : > { %v937_v21 = vpop.permute.xlu1 %936 }
  0xea   : > { %v947_v22 = vsel %vm946_vm8, %v935_v20, %v937_v21 }
  0xeb   : > { %1440 = vmatpush3.bf16.msra.mxu1 %v947_v22  ;;  %v554_v26 = vpop.f32.mrf.mxu1 }
  0xec   : > { %v1008_v24 = vpop.permute.xlu0 %1007 }
  0xed   : > { %v1010_v25 = vpop.permute.xlu1 %1009  ;;  %v1383_v5 = vpop.f32.mrf.mxu1 }
  0xee   : > { %v1020_v27 = vsel %vm1019_vm9, %v1008_v24, %v1010_v25  ;;  %1442 = vmatmul.mubr.msk.bf16.vlgmr.msra.gmra.mxu1 %vm467_vm1, %v1527_v23 }
  0xef   : > { %1450 = vmatpush3.bf16.msra.mxu0 %v1020_v27  ;;  %v557_v29 = vpop.f32.mrf.mxu1 }
  0xf1   : > { %v1384_v30 = vpop.f32.mrf.mxu1 }
  0xf2   : > { %1452 = vmatmul.mubr.msk.bf16.vlgmr.msra.gmra.mxu0 %vm467_vm1, %v1528_v28 }
  0xf9   : > { %v1077_v10 = vpop.permute.xlu0 %1076 }
  0xfa   : > { %v1082_v15 = vpop.permute.xlu1 %1081 }
 0x161   : > { %v505_v31 = vpop.f32.mrf.mxu0 }
 0x162   : > { %v555_v54 = vadd.f32 %v554_v26, %v505_v31 }
 0x163   : > { %v1373_v32 = vpop.f32.mrf.mxu0 }
 0x165   : > { %v508_v33 = vpop.f32.mrf.mxu0 }
 0x166   : > { %v558_v57 = vadd.f32 %v557_v29, %v508_v33 }
 0x167   : > { %v1374_v34 = vpop.f32.mrf.mxu0 }
 0x16d   : > { %v625_v35 = vpop.f32.mrf.mxu0 }
 0x16e   : > { %v632_v56 = vadd.f32 %v625_v35, %v555_v54 }
 0x16f   : > { %v1393_v36 = vpop.f32.mrf.mxu0 }
 0x171   : > { %v628_v37 = vpop.f32.mrf.mxu0 }
 0x172   : > { %v633_v58 = vadd.f32 %v628_v37, %v558_v57 }
 0x173   : > { %v1394_v38 = vpop.f32.mrf.mxu0 }
 0x17e   : > { %v698_v39 = vpop.f32.mrf.mxu1 }
 0x17f   : > { %v705_v59 = vadd.f32 %v698_v39, %v632_v56 }
 0x180   : > { %v1403_v40 = vpop.f32.mrf.mxu1 }
 0x182   : > { %v771_v41 = vpop.f32.mrf.mxu0  ;;  %v701_v42 = vpop.f32.mrf.mxu1 }
 0x183   : > { %v778_v60 = vadd.f32 %v771_v41, %v705_v59  ;;  %v706_v61 = vadd.f32 %v701_v42, %v633_v58 }
 0x184   : > { %v1413_v43 = vpop.f32.mrf.mxu0  ;;  %v1404_v44 = vpop.f32.mrf.mxu1 }
 0x186   : > { %v774_v45 = vpop.f32.mrf.mxu0 }
 0x187   : > { %v779_v0 = vadd.f32 %v774_v45, %v706_v61 }
 0x188   : > { %v1414_v46 = vpop.f32.mrf.mxu0 }
 0x196   : > { %v844_v47 = vpop.f32.mrf.mxu1 }
 0x197   : > { %v851_v62 = vadd.f32 %v844_v47, %v778_v60 }
 0x198   : > { %v1423_v48 = vpop.f32.mrf.mxu1 }
 0x19a   : > { %v847_v49 = vpop.f32.mrf.mxu1  ;;  %v917_v50 = vpop.f32.mrf.mxu0 }
 0x19b   : > { %v924_v1 = vadd.f32 %v917_v50, %v851_v62  ;;  %v852_v3 = vadd.f32 %v847_v49, %v779_v0 }
 0x19c   : > { %v1433_v51 = vpop.f32.mrf.mxu0  ;;  %v1424_v52 = vpop.f32.mrf.mxu1 }
 0x19e   : > { %v920_v53 = vpop.f32.mrf.mxu0 }
 0x19f   : > { %v925_v8 = vadd.f32 %v920_v53, %v852_v3 }
 0x1a0   : > { %v1434_v55 = vpop.f32.mrf.mxu0 }
 0x1ae   : > { %v990_v63 = vpop.f32.mrf.mxu1 }
 0x1af   : > { %v997_v4 = vadd.f32 %v990_v63, %v924_v1 }
 0x1b0   : > { %v1443_v2 = vpop.f32.mrf.mxu1 }
 0x1b2   : > { %v993_v6 = vpop.f32.mrf.mxu1  ;;  %v1063_v7 = vpop.f32.mrf.mxu0 }
 0x1b3   : > { %v1070_v9 = vadd.f32 %v1063_v7, %v997_v4  ;;  %v998_v13 = vadd.f32 %v993_v6, %v925_v8 }
 0x1b4   : > { %v1453_v11 = vpop.f32.mrf.mxu0  ;;  %v1444_v12 = vpop.f32.mrf.mxu1 }
 0x1b5   : > { %v1084_v16 = vadd.f32 %v1077_v10, %v1070_v9 }
 0x1b6   : > { %v1066_v14 = vpop.f32.mrf.mxu0 }
 0x1b7   : > { %v1071_v17 = vadd.f32 %v1066_v14, %v998_v13  ;;  %v1093_v21 = vmul.f32 %v1322_v18, %v1084_v16 }
 0x1b8   : > { %v1454_v19 = vpop.f32.mrf.mxu0 }
 0x1b9   : > { %v1085_v20 = vadd.f32 %v1082_v15, %v1071_v17 }
 0x1bb   : > { %v1094_v22 = vmul.f32 %v1322_v18, %v1085_v20 }
 0x1bd   : > { %v1095_v23 = vpack.c.bf16 %v1094_v22, %v1093_v21 }
 0x1bf   : > { %1097 = vrot.lane.b32.xlu1 %v1095_v23, %s1580_s9 }
 0x231   : > { %v1098_v24 = vpop.permute.xlu1 %1097 }
 0x232   : > { %v1102_v25 = vsel %vm1099_vm10, 0, %v1098_v24  ;;  %v1103_v26 = vsel %vm1099_vm10, %v1098_v24, 0 }
 0x233   : > { %v1323_v27 = vcombine.low %v1102_v25, %v1103_v26  ;;  %v1324_v28 = vcombine.high %v1102_v25, %v1103_v26 }
 0x235   : > { %1114 = vst [vmem:[%s1664_s27] sm:$0xff] %v1323_v27  ;;  %1115 = vst [vmem:[%s1664_s27 + $0x8] sm:$0xff] %v1324_v28 }
 0x236 PF: > { %1118 = sbr.rel (!%p1669_p11) target bundleno = 571 (0x23b), region = 52  ;;  %v1581_v5 = vmov (%p1669_p11), 0  }
 0x237   : > { %1119 = vst [vmem:[%s1664_s27] sm:$0xff] (%p1669_p11), %v1581_v5  ;;  %1120 = vst [vmem:[%s1664_s27 + $0x8] sm:$0xff] (%p1669_p11), %v1581_v5 }
 0x23b PF: > { %s16_s25 = sadd.s32 1, %s1567_s25   ;;  %s1882_s10 = sld [smem:[#allocation2_spill]] }
 0x23c   : > { %p13_p12 = scmp.ge.s32.totalorder %s16_s25, 14   ;;  %s1883_s21 = smov %s1559_s23 }
 0x23d   : > { %s1884_s22 = smov %s1563_s24  ;;  %s1885_s23 = smov %s1888_s26 }
 0x23e   :  { %15 = sbr.rel (!%p13_p12) target bundleno = 3 (0x3), region = 96 }
 0x241   : > { %s1886_s24 = smov %s1882_s10 }

// kernel: a_call__.4
= control target key start
LH: loop header
LB: loop body
LE: loop exit
PB: predicated region body
PF: predicated region fallthrough
CT: control target
= control target key end

     0   :  { %s1712_s24 = smov 0   ;;  %s1714_s25 = smov 0   ;;  %s1940_s0 = inlined_call_operand.vmem [shape: bf16[2,6,16,256], index: 0, kind: input, shape index: {}, may-alias: {0,1,2}]   ;;  %s1941_s1 = inlined_call_operand.vmem [shape: bf16[2,6,16,256], index: 1, kind: input, shape index: {}, may-alias: {0,1,2}]   ;;  %s1942_s2 = inlined_call_operand.vmem [shape: bf16[2,6,16,256], index: 2, kind: input, shape index: {}, may-alias: {0,1,2}]   ;;  %s1943_s3 = inlined_call_operand.vmem [shape: bf16[9,16,48], index: 3, kind: input, shape index: {}]   ;;  %s1944_s4 = inlined_call_operand.vmem [shape: f32[16,1], index: 4, kind: input, shape index: {}]   ;;  %s1945_s5 = inlined_call_operand.vmem [shape: f32[1,128], index: 5, kind: input, shape index: {}]   ;;  %s1946_s6 = inlined_call_operand.vmem [shape: bf16[2,4,16,128], index: 6, kind: output, shape index: {0}]   ;;  %s1947_s7 = inlined_call_operand.vmem [shape: f32[2,2,128], index: 7, kind: output, shape index: {1}]  }
   0x1   :  { %s1716_s26 = smov 0   ;;  %s1718_s27 = smov 0  }
   0x2   :  { %s1720_s28 = smov 0  }
   0x3 LB: > { %s27_s29 = sadd.s32 1, %s1650_s26  ;;  %s30_s30 = sadd.s32 1, %s1654_s27  ;;  %s1658_s28 = sphi %s1720_s28, %s18_s28   ;;  %s1654_s27 = sphi %s1718_s27, %s1951_s27   ;;  %s1650_s26 = sphi %s1716_s26, %s1950_s26   ;;  %s1646_s25 = sphi %s1714_s25, %s1949_s25   ;;  %s1642_s24 = sphi %s1712_s24, %s1948_s24  }
   0x4   : > { %p28_p0 = scmp.ge.s32.totalorder %s27_s29, 4  ;;  %p1348_p1 = scmp.ge.s32.totalorder %s1658_s28, 1 }
   0x5   : > { %p300_p2 = scmp.lt.s32.totalorder %s1658_s28, 9 }
   0x6   : > { %s1953_s29 = smov (%p28_p0, %s27_s29), 0  ;;  %s1955_s30 = smov (!%p28_p0, %s30_s30), %s1654_s27 }
   0x7   : > { %p301_p3 = pnand %p1348_p1, %p300_p2  ;;  %p32_p4 = scmp.ge.s32.totalorder %s1955_s30, 2 }
   0x8   : > { %p364_p5 = scmp.lt.s32.totalorder (!%p301_p3), %s1646_s25, 1  ;;  %s384_s8 = sadd.s32 (!%p301_p3), 2, %s1642_s24 }
   0x9   : > { %s1957_s30 = smov (%p32_p4, %s1955_s30), 0  ;;  %304 = sbr.rel (%p301_p3) target bundleno = 739 (0x2e3), region = 44 }
   0xa   : > { %p387_p6 = scmp.lt.s32.totalorder (!%p301_p3), %s384_s8, 5  ;;  %s373_s16 = sadd.s32 (!%p301_p3), 1, %s1642_s24 }
   0xb   : > { %p376_p7 = scmp.lt.s32.totalorder (!%p301_p3), %s373_s16, 5  ;;  %p366_p8 = scmp.lt.s32.totalorder (!%p301_p3), %s1642_s24, 5 }
   0xc   : > { %s1661_s22 = smov (!%p301_p3), 127   ;;  %s1669_s13 = smov (!%p301_p3), 106  }
   0xd   : > { %p397_p9 = scmp.lt.s32.totalorder (!%p301_p3), %s1642_s24, 3  ;;  %p1402_p10 = scmp.ne.s32.totalorder (!%p301_p3), %s1642_s24, 0 }
   0xe   : > { %s1959_s25 = smov (!%p364_p5, %s1646_s25), 1  ;;  %s1961_s8 = smov (!%p387_p6, %s384_s8), 5  ;;  %v1660_v0 = vmov 0.0   ;;  %vm1662_vm0 = vmmov 0   ;;  %v1610_v7 = vld [vmem:[%s1943_s3] sm:$0xff]   ;;  %vm471_vm1 = vcmask 392192  }
   0xf   : > { %s1539_s9 = smul.u32 24, %s1959_s25  ;;  %s1358_s10 = sshll.u32 %s1959_s25, 1  ;;  %1449 = vmatprep.subr.bf16.mxu0 %v1660_v0  ;;  %1459 = vmatprep.subr.bf16.mxu1 %v1660_v0  ;;  %v1670_v8 = vmov 0   ;;  %v1076_v9 = vld [vmem:[%s1944_s4] sm:$0xff]  ;;  %v1077_v10 = vld [vmem:[%s1944_s4 + $0x8] sm:$0xff]  ;;  %vm464_vm2 = vcmask 1039360  }
  0x10   : > { %s1353_s11 = sshll.u32 %s1961_s8, 2  ;;  %s1752_s14 = scalar_lea.vmem %s1947_s7, %s1358_s10  ;;  %1455 = vmatprep.mubr.msk.bf16.mxu0 %vm1662_vm0, %v1660_v0  ;;  %1465 = vmatprep.mubr.msk.bf16.mxu1 %vm1662_vm0, %v1660_v0  ;;  %v1609_v21 = vld [vmem:[%s1943_s3 + $0x8] sm:$0xff]   ;;  %vm585_vm3 = vcmask 1031168   ;;  %v1611_v31 = vld [vmem:[%s1943_s3 + $0x10] sm:$0xff]   ;;  %vm658_vm4 = vcmask 965632   ;;  %vm731_vm5 = vcmask 957440  }
  0x11   : > { %s391_s15 = sadd.s32 %s1539_s9, %s1353_s11  ;;  %s1963_s16 = smov (!%p376_p7, %s373_s16), 5  ;;  %1598 = vset.pattern.permute.xlu0 %v1670_v8  ;;  %1599 = vset.pattern.permute.xlu1 %v1670_v8  ;;  %v1612_v47 = vld [vmem:[%s1943_s3 + $0x18] sm:$0xff]   ;;  %v1613_v51 = vld [vmem:[%s1943_s3 + $0x20] sm:$0xff]   ;;  %vm804_vm6 = vcmask 949248   ;;  %vm877_vm7 = vcmask 883712   ;;  %v1615_v8 = vld [vmem:[%s1943_s3 + $0x30] sm:$0xff]  }
  0x12   : > { %s1354_s17 = sshll.u32 %s391_s15, 2  ;;  %s1351_s23 = sshll.u32 %s1963_s16, 2  ;;  %vm950_vm8 = vcmask 875520   ;;  %vm1023_vm9 = vcmask 867328  }
  0x13   : > { %s393_s20 = scalar_lea.vmem %s1942_s2, %s1354_s17  ;;  %s380_s8 = sadd.s32 %s1539_s9, %s1351_s23 }
  0x14   : > { %v1761_v1 = vld [vmem:[%s393_s20] ss:$8 sps:$4 sm:$0xff]   ;;  %s367_s21 = scalar_select %p366_p8, %s1642_s24, 5  ;;  %v1766_v2 = vld [vmem:[%s393_s20 + $0x4] ss:$8 sps:$4 sm:$0xff]  }
  0x15   : > { %460 = vrot.lane.b32.xlu0 %v1761_v1, %s1661_s22  ;;  %1460 = vmatpush3.bf16.msra.mxu1 %v1761_v1  ;;  %s1352_s11 = sshll.u32 %s380_s8, 2  ;;  %s1664_s8 = smov 118  }
  0x16   : > { %s1349_s10 = sshll.u32 %s367_s21, 2  ;;  %1461 = vmatprep.subr.bf16.mxu1 %v1660_v0  ;;  %s382_s17 = scalar_lea.vmem %s1941_s1, %s1352_s11 }
  0x17   : > { %s370_s12 = sadd.s32 %s1539_s9, %s1349_s10  ;;  %v1602_v3 = vld [vmem:[%s382_s17] ss:$8 sps:$4 sm:$0xff]   ;;  %v1605_v4 = vld [vmem:[%s382_s17 + $0x4] ss:$8 sps:$4 sm:$0xff]   ;;  %s1663_s9 = smov 126  }
  0x18   : > { %s1350_s18 = sshll.u32 %s370_s12, 2  ;;  %456 = vrot.lane.b32.xlu1 %v1602_v3, %s1661_s22  ;;  %s1666_s10 = smov 116  }
  0x19   : > { %462 = vrot.lane.b32.xlu0 %v1766_v2, %s1661_s22  ;;  %s372_s20 = scalar_lea.vmem %s1940_s0, %s1350_s18  ;;  %1462 = vmatpush3.bf16.msra.mxu1 %v1602_v3  ;;  %s1667_s11 = smov 108  }
  0x1a   : > { %v1779_v5 = vld [vmem:[%s372_s20] ss:$8 sps:$4 sm:$0xff]   ;;  %1463 = vmatprep.subr.bf16.mxu1 %v1660_v0  ;;  %v1606_v6 = vld [vmem:[%s372_s20 + $0x4] ss:$8 sps:$4 sm:$0xff]   ;;  %s1668_s12 = smov 107   ;;  %s1356_s21 = sshll.u32 %s1959_s25, 3 }
  0x1b   : > { %s398_s20 = scalar_select %p397_p9, %s1642_s24, 3 }
  0x1c   : > { %458 = vrot.lane.b32.xlu1 %v1605_v4, %s1661_s22 }
  0x1d   : > { %452 = vrot.lane.b32.xlu0 %v1779_v5, %s1661_s22  ;;  %1464 = vmatpush3.bf16.msra.mxu1 %v1779_v5 }
  0x1e   : > { %1479 = vmatprep.subr.bf16.mxu1 %v1660_v0 }
  0x20   : > { %454 = vrot.lane.b32.xlu1 %v1606_v6, %s1661_s22  ;;  %1466 = vmatmul.mubr.msk.bf16.vlgmr.msra.gmra.mxu1 %vm471_vm1, %v1610_v7  ;;  %s1665_s22 = smov 117  }
  0x21   : > { %581 = vrot.lane.b32.xlu0 %v1761_v1, %s1663_s9  ;;  %1485 = vmatprep.mubr.msk.bf16.mxu1 %vm1662_vm0, %v1660_v0 }
  0x24   : > { %583 = vrot.lane.b32.xlu1 %v1766_v2, %s1663_s9 }
  0x25   : > { %577 = vrot.lane.b32.xlu0 %v1602_v3, %s1663_s9 }
  0x28   : > { %579 = vrot.lane.b32.xlu1 %v1605_v4, %s1663_s9 }
  0x29   : > { %573 = vrot.lane.b32.xlu0 %v1779_v5, %s1663_s9 }
  0x2c   : > { %575 = vrot.lane.b32.xlu1 %v1606_v6, %s1663_s9  ;;  %s1355_s9 = sshll.u32 %s398_s20, 1 }
  0x2d   : > { %654 = vrot.lane.b32.xlu0 %v1761_v1, %s1664_s8  ;;  %s401_s23 = sadd.s32 %s1356_s21, %s1355_s9 }
  0x30   : > { %656 = vrot.lane.b32.xlu1 %v1766_v2, %s1664_s8 }
  0x31   : > { %727 = vrot.lane.b32.xlu0 %v1761_v1, %s1665_s22 }
  0x34   : > { %729 = vrot.lane.b32.xlu1 %v1766_v2, %s1665_s22 }
  0x35   : > { %650 = vrot.lane.b32.xlu0 %v1602_v3, %s1664_s8 }
  0x38   : > { %652 = vrot.lane.b32.xlu1 %v1605_v4, %s1664_s8 }
  0x39   : > { %723 = vrot.lane.b32.xlu0 %v1602_v3, %s1665_s22 }
  0x3c   : > { %725 = vrot.lane.b32.xlu1 %v1605_v4, %s1665_s22 }
  0x3d   : > { %646 = vrot.lane.b32.xlu0 %v1779_v5, %s1664_s8 }
  0x40   : > { %648 = vrot.lane.b32.xlu1 %v1606_v6, %s1664_s8 }
  0x41   : > { %719 = vrot.lane.b32.xlu0 %v1779_v5, %s1665_s22 }
  0x44   : > { %721 = vrot.lane.b32.xlu1 %v1606_v6, %s1665_s22 }
  0x45   : > { %800 = vrot.lane.b32.xlu0 %v1761_v1, %s1666_s10 }
  0x48   : > { %802 = vrot.lane.b32.xlu1 %v1766_v2, %s1666_s10 }
  0x49   : > { %873 = vrot.lane.b32.xlu0 %v1761_v1, %s1667_s11 }
  0x4c   : > { %875 = vrot.lane.b32.xlu1 %v1766_v2, %s1667_s11 }
  0x4d   : > { %796 = vrot.lane.b32.xlu0 %v1602_v3, %s1666_s10 }
  0x50   : > { %798 = vrot.lane.b32.xlu1 %v1605_v4, %s1666_s10 }
  0x51   : > { %869 = vrot.lane.b32.xlu0 %v1602_v3, %s1667_s11 }
  0x54   : > { %871 = vrot.lane.b32.xlu1 %v1605_v4, %s1667_s11 }
  0x55   : > { %792 = vrot.lane.b32.xlu0 %v1779_v5, %s1666_s10 }
  0x58   : > { %794 = vrot.lane.b32.xlu1 %v1606_v6, %s1666_s10  ;;  %s1357_s10 = sshll.u32 %s401_s23, 2 }
  0x59   : > { %865 = vrot.lane.b32.xlu0 %v1779_v5, %s1667_s11  ;;  %s403_s25 = scalar_lea.vmem %s1946_s6, %s1357_s10 }
  0x5c   : > { %867 = vrot.lane.b32.xlu1 %v1606_v6, %s1667_s11 }
  0x5d   : > { %946 = vrot.lane.b32.xlu0 %v1761_v1, %s1668_s12 }
  0x60   : > { %948 = vrot.lane.b32.xlu1 %v1766_v2, %s1668_s12 }
  0x61   : > { %1019 = vrot.lane.b32.xlu0 %v1761_v1, %s1669_s13 }
  0x64   : > { %1021 = vrot.lane.b32.xlu1 %v1766_v2, %s1669_s13 }
  0x65   : > { %942 = vrot.lane.b32.xlu0 %v1602_v3, %s1668_s12 }
  0x68   : > { %944 = vrot.lane.b32.xlu1 %v1605_v4, %s1668_s12 }
  0x69   : > { %1015 = vrot.lane.b32.xlu0 %v1602_v3, %s1669_s13 }
  0x6c   : > { %1017 = vrot.lane.b32.xlu1 %v1605_v4, %s1669_s13  ;;  %v1614_v4 = vld [vmem:[%s1943_s3 + $0x28] sm:$0xff]  }
  0x6d   : > { %938 = vrot.lane.b32.xlu0 %v1779_v5, %s1668_s12 }
  0x70   : > { %940 = vrot.lane.b32.xlu1 %v1606_v6, %s1668_s12 }
  0x71   : > { %1011 = vrot.lane.b32.xlu0 %v1779_v5, %s1669_s13 }
  0x74   : > { %1013 = vrot.lane.b32.xlu1 %v1606_v6, %s1669_s13 }
  0x75   : > { %1080 = vperm.xlu0 %1598, %v1076_v9  }
  0x78   : > { %1085 = vperm.xlu1 %1599, %v1077_v10  }
  0x87   : > { %v461_v11 = vpop.permute.xlu0 %460 }
  0x8a   : > { %v457_v14 = vpop.permute.xlu1 %456 }
  0x8b   : > { %v463_v12 = vpop.permute.xlu0 %462 }
  0x8c   : > { %v467_v13 = vsel %vm464_vm2, %v461_v11, %v463_v12 }
  0x8d   : > { %1450 = vmatpush3.bf16.msra.mxu0 %v467_v13 }
  0x8e   : > { %1451 = vmatprep.subr.bf16.mxu0 %v1660_v0  ;;  %v459_v16 = vpop.permute.xlu1 %458 }
  0x8f   : > { %v453_v15 = vpop.permute.xlu0 %452  ;;  %v466_v17 = vsel %vm464_vm2, %v457_v14, %v459_v16 }
  0x91   : > { %1452 = vmatpush3.bf16.msra.mxu0 %v466_v17 }
  0x92   : > { %1453 = vmatprep.subr.bf16.mxu0 %v1660_v0  ;;  %v455_v19 = vpop.permute.xlu1 %454 }
  0x93   : > { %v582_v18 = vpop.permute.xlu0 %581  ;;  %v465_v20 = vsel %vm464_vm2, %v453_v15, %v455_v19 }
  0x95   : > { %1454 = vmatpush3.bf16.msra.mxu0 %v465_v20 }
  0x96   : > { %1469 = vmatprep.subr.bf16.mxu0 %v1660_v0  ;;  %v584_v23 = vpop.permute.xlu1 %583 }
  0x97   : > { %v578_v22 = vpop.permute.xlu0 %577  ;;  %v588_v24 = vsel %vm585_vm3, %v582_v18, %v584_v23  ;;  %v1616_v23 = vld [vmem:[%s1943_s3 + $0x38] sm:$0xff]  }
  0x98   : > { %1456 = vmatmul.mubr.msk.bf16.vlgmr.msra.gmra.mxu0 %vm471_vm1, %v1609_v21 }
  0x99   : > { %1470 = vmatpush3.bf16.msra.mxu0 %v588_v24  ;;  %1475 = vmatprep.mubr.msk.bf16.mxu0 %vm1662_vm0, %v1660_v0 }
  0x9a   : > { %1471 = vmatprep.subr.bf16.mxu0 %v1660_v0  ;;  %v580_v26 = vpop.permute.xlu1 %579 }
  0x9b   : > { %v574_v25 = vpop.permute.xlu0 %573  ;;  %v587_v27 = vsel %vm585_vm3, %v578_v22, %v580_v26 }
  0x9d   : > { %1472 = vmatpush3.bf16.msra.mxu0 %v587_v27 }
  0x9e   : > { %1473 = vmatprep.subr.bf16.mxu0 %v1660_v0  ;;  %v576_v29 = vpop.permute.xlu1 %575 }
  0x9f   : > { %v655_v28 = vpop.permute.xlu0 %654  ;;  %v586_v30 = vsel %vm585_vm3, %v574_v25, %v576_v29 }
  0xa1   : > { %1474 = vmatpush3.bf16.msra.mxu0 %v586_v30 }
  0xa2   : > { %1489 = vmatprep.subr.bf16.mxu0 %v1660_v0  ;;  %v657_v33 = vpop.permute.xlu1 %656 }
  0xa3   : > { %v728_v32 = vpop.permute.xlu0 %727  ;;  %v661_v34 = vsel %vm658_vm4, %v655_v28, %v657_v33 }
  0xa4   : > { %1476 = vmatmul.mubr.msk.bf16.vlgmr.msra.gmra.mxu0 %vm471_vm1, %v1611_v31  ;;  %1480 = vmatpush3.bf16.msra.mxu1 %v661_v34 }
  0xa5   : > { %1495 = vmatprep.mubr.msk.bf16.mxu0 %vm1662_vm0, %v1660_v0  ;;  %1481 = vmatprep.subr.bf16.mxu1 %v1660_v0 }
  0xa6   : > { %v730_v36 = vpop.permute.xlu1 %729 }
  0xa7   : > { %v651_v35 = vpop.permute.xlu0 %650  ;;  %v734_v37 = vsel %vm731_vm5, %v728_v32, %v730_v36 }
  0xa8   : > { %1490 = vmatpush3.bf16.msra.mxu0 %v734_v37 }
  0xa9   : > { %1491 = vmatprep.subr.bf16.mxu0 %v1660_v0 }
  0xaa   : > { %v653_v39 = vpop.permute.xlu1 %652 }
  0xab   : > { %v724_v38 = vpop.permute.xlu0 %723  ;;  %v660_v40 = vsel %vm658_vm4, %v651_v35, %v653_v39 }
  0xac   : > { %1482 = vmatpush3.bf16.msra.mxu1 %v660_v40 }
  0xad   : > { %1483 = vmatprep.subr.bf16.mxu1 %v1660_v0 }
  0xae   : > { %v726_v42 = vpop.permute.xlu1 %725 }
  0xaf   : > { %v647_v41 = vpop.permute.xlu0 %646  ;;  %v733_v43 = vsel %vm731_vm5, %v724_v38, %v726_v42 }
  0xb0   : > { %1492 = vmatpush3.bf16.msra.mxu0 %v733_v43 }
  0xb1   : > { %1493 = vmatprep.subr.bf16.mxu0 %v1660_v0 }
  0xb2   : > { %v649_v45 = vpop.permute.xlu1 %648 }
  0xb3   : > { %v720_v44 = vpop.permute.xlu0 %719  ;;  %v659_v46 = vsel %vm658_vm4, %v647_v41, %v649_v45 }
  0xb4   : > { %1484 = vmatpush3.bf16.msra.mxu1 %v659_v46 }
  0xb5   : > { %1499 = vmatprep.subr.bf16.mxu1 %v1660_v0 }
  0xb6   : > { %v722_v49 = vpop.permute.xlu1 %721 }
  0xb7   : > { %v801_v48 = vpop.permute.xlu0 %800  ;;  %v732_v50 = vsel %vm731_vm5, %v720_v44, %v722_v49  ;;  %1486 = vmatmul.mubr.msk.bf16.vlgmr.msra.gmra.mxu1 %vm471_vm1, %v1612_v47 }
  0xb8   : > { %1494 = vmatpush3.bf16.msra.mxu0 %v732_v50  ;;  %1505 = vmatprep.mubr.msk.bf16.mxu1 %vm1662_vm0, %v1660_v0 }
  0xb9   : > { %1509 = vmatprep.subr.bf16.mxu0 %v1660_v0 }
  0xba   : > { %v803_v53 = vpop.permute.xlu1 %802 }
  0xbb   : > { %v874_v52 = vpop.permute.xlu0 %873  ;;  %v807_v54 = vsel %vm804_vm6, %v801_v48, %v803_v53  ;;  %1496 = vmatmul.mubr.msk.bf16.vlgmr.msra.gmra.mxu0 %vm471_vm1, %v1613_v51 }
  0xbc   : > { %1500 = vmatpush3.bf16.msra.mxu1 %v807_v54  ;;  %1515 = vmatprep.mubr.msk.bf16.mxu0 %vm1662_vm0, %v1660_v0 }
  0xbd   : > { %1501 = vmatprep.subr.bf16.mxu1 %v1660_v0 }
  0xbe   : > { %v876_v56 = vpop.permute.xlu1 %875 }
  0xbf   : > { %v797_v55 = vpop.permute.xlu0 %796  ;;  %v880_v57 = vsel %vm877_vm7, %v874_v52, %v876_v56 }
  0xc0   : > { %1510 = vmatpush3.bf16.msra.mxu0 %v880_v57 }
  0xc1   : > { %1511 = vmatprep.subr.bf16.mxu0 %v1660_v0 }
  0xc2   : > { %v799_v59 = vpop.permute.xlu1 %798 }
  0xc3   : > { %v870_v58 = vpop.permute.xlu0 %869  ;;  %v806_v60 = vsel %vm804_vm6, %v797_v55, %v799_v59 }
  0xc4   : > { %1502 = vmatpush3.bf16.msra.mxu1 %v806_v60 }
  0xc5   : > { %1503 = vmatprep.subr.bf16.mxu1 %v1660_v0 }
  0xc6   : > { %v872_v62 = vpop.permute.xlu1 %871 }
  0xc7   : > { %v793_v61 = vpop.permute.xlu0 %792  ;;  %v879_v63 = vsel %vm877_vm7, %v870_v58, %v872_v62 }
  0xc8   : > { %1512 = vmatpush3.bf16.msra.mxu0 %v879_v63 }
  0xc9   : > { %1513 = vmatprep.subr.bf16.mxu0 %v1660_v0 }
  0xca   : > { %v795_v2 = vpop.permute.xlu1 %794 }
  0xcb   : > { %v866_v1 = vpop.permute.xlu0 %865  ;;  %v805_v3 = vsel %vm804_vm6, %v793_v61, %v795_v2 }
  0xcc   : > { %1504 = vmatpush3.bf16.msra.mxu1 %v805_v3 }
  0xcd   : > { %1519 = vmatprep.subr.bf16.mxu1 %v1660_v0 }
  0xce   : > { %v868_v6 = vpop.permute.xlu1 %867 }
  0xcf   : > { %v947_v5 = vpop.permute.xlu0 %946  ;;  %v878_v7 = vsel %vm877_vm7, %v866_v1, %v868_v6  ;;  %1506 = vmatmul.mubr.msk.bf16.vlgmr.msra.gmra.mxu1 %vm471_vm1, %v1614_v4 }
  0xd0   : > { %1514 = vmatpush3.bf16.msra.mxu0 %v878_v7  ;;  %1525 = vmatprep.mubr.msk.bf16.mxu1 %vm1662_vm0, %v1660_v0 }
  0xd1   : > { %1529 = vmatprep.subr.bf16.mxu0 %v1660_v0 }
  0xd2   : > { %v949_v10 = vpop.permute.xlu1 %948 }
  0xd3   : > { %v1020_v9 = vpop.permute.xlu0 %1019  ;;  %v953_v11 = vsel %vm950_vm8, %v947_v5, %v949_v10  ;;  %1516 = vmatmul.mubr.msk.bf16.vlgmr.msra.gmra.mxu0 %vm471_vm1, %v1615_v8 }
  0xd4   : > { %1520 = vmatpush3.bf16.msra.mxu1 %v953_v11  ;;  %1535 = vmatprep.mubr.msk.bf16.mxu0 %vm1662_vm0, %v1660_v0 }
  0xd5   : > { %1521 = vmatprep.subr.bf16.mxu1 %v1660_v0 }
  0xd6   : > { %v1022_v13 = vpop.permute.xlu1 %1021 }
  0xd7   : > { %v943_v12 = vpop.permute.xlu0 %942  ;;  %v1026_v14 = vsel %vm1023_vm9, %v1020_v9, %v1022_v13 }
  0xd8   : > { %1530 = vmatpush3.bf16.msra.mxu0 %v1026_v14 }
  0xd9   : > { %1531 = vmatprep.subr.bf16.mxu0 %v1660_v0 }
  0xda   : > { %v945_v16 = vpop.permute.xlu1 %944 }
  0xdb   : > { %v1016_v15 = vpop.permute.xlu0 %1015  ;;  %v952_v17 = vsel %vm950_vm8, %v943_v12, %v945_v16 }
  0xdc   : > { %1522 = vmatpush3.bf16.msra.mxu1 %v952_v17 }
  0xdd   : > { %1523 = vmatprep.subr.bf16.mxu1 %v1660_v0 }
  0xde   : > { %v1018_v18 = vpop.permute.xlu1 %1017 }
  0xdf   : > { %v939_v19 = vpop.permute.xlu0 %938  ;;  %v1025_v20 = vsel %vm1023_vm9, %v1016_v15, %v1018_v18  ;;  %v1399_v18 = vld [vmem:[%s1945_s5] ss:$0 sm:$0xff] }
  0xe0   : > { %1532 = vmatpush3.bf16.msra.mxu0 %v1025_v20  ;;  %v558_v25 = vpop.f32.mrf.mxu1 }
  0xe1   : > { %1533 = vmatprep.subr.bf16.mxu0 %v1660_v0  ;;  %v1617_v0 = vld [vmem:[%s1943_s3 + $0x40] sm:$0xff]  }
  0xe2   : > { %v941_v21 = vpop.permute.xlu1 %940  ;;  %v1467_v27 = vpop.f32.mrf.mxu1 }
  0xe3   : > { %v951_v22 = vsel %vm950_vm8, %v939_v19, %v941_v21  ;;  %v1012_v24 = vpop.permute.xlu0 %1011 }
  0xe4   : > { %1524 = vmatpush3.bf16.msra.mxu1 %v951_v22  ;;  %v561_v29 = vpop.f32.mrf.mxu1 }
  0xe6   : > { %v1014_v26 = vpop.permute.xlu1 %1013  ;;  %v1468_v30 = vpop.f32.mrf.mxu1 }
  0xe7   : > { %v1024_v28 = vsel %vm1023_vm9, %v1012_v24, %v1014_v26  ;;  %1526 = vmatmul.mubr.msk.bf16.vlgmr.msra.gmra.mxu1 %vm471_vm1, %v1616_v23 }
  0xe8   : > { %1534 = vmatpush3.bf16.msra.mxu0 %v1024_v28 }
  0xeb   : > { %1536 = vmatmul.mubr.msk.bf16.vlgmr.msra.gmra.mxu0 %vm471_vm1, %v1617_v0 }
  0xf0   : > { %v1081_v10 = vpop.permute.xlu0 %1080 }
  0xf3   : > { %v1086_v15 = vpop.permute.xlu1 %1085 }
 0x158   : > { %v509_v31 = vpop.f32.mrf.mxu0 }
 0x159   : > { %v559_v35 = vadd.f32 %v558_v25, %v509_v31 }
 0x15a   : > { %v1457_v32 = vpop.f32.mrf.mxu0 }
 0x15c   : > { %v512_v33 = vpop.f32.mrf.mxu0 }
 0x15d   : > { %v562_v57 = vadd.f32 %v561_v29, %v512_v33 }
 0x15e   : > { %v1458_v34 = vpop.f32.mrf.mxu0 }
 0x164   : > { %v629_v36 = vpop.f32.mrf.mxu0 }
 0x165   : > { %v636_v37 = vadd.f32 %v629_v36, %v559_v35 }
 0x166   : > { %v1477_v38 = vpop.f32.mrf.mxu0 }
 0x168   : > { %v632_v39 = vpop.f32.mrf.mxu0 }
 0x169   : > { %v637_v58 = vadd.f32 %v632_v39, %v562_v57 }
 0x16a   : > { %v1478_v40 = vpop.f32.mrf.mxu0 }
 0x177   : > { %v702_v41 = vpop.f32.mrf.mxu1 }
 0x178   : > { %v709_v59 = vadd.f32 %v702_v41, %v636_v37 }
 0x179   : > { %v1487_v42 = vpop.f32.mrf.mxu1 }
 0x17b   : > { %v775_v43 = vpop.f32.mrf.mxu0  ;;  %v705_v44 = vpop.f32.mrf.mxu1 }
 0x17c   : > { %v782_v60 = vadd.f32 %v775_v43, %v709_v59  ;;  %v710_v61 = vadd.f32 %v705_v44, %v637_v58 }
 0x17d   : > { %v1497_v45 = vpop.f32.mrf.mxu0  ;;  %v1488_v46 = vpop.f32.mrf.mxu1 }
 0x17f   : > { %v778_v47 = vpop.f32.mrf.mxu0 }
 0x180   : > { %v783_v1 = vadd.f32 %v778_v47, %v710_v61 }
 0x181   : > { %v1498_v48 = vpop.f32.mrf.mxu0 }
 0x18f   : > { %v848_v49 = vpop.f32.mrf.mxu1 }
 0x190   : > { %v855_v62 = vadd.f32 %v848_v49, %v782_v60 }
 0x191   : > { %v1507_v50 = vpop.f32.mrf.mxu1 }
 0x193   : > { %v851_v51 = vpop.f32.mrf.mxu1  ;;  %v921_v52 = vpop.f32.mrf.mxu0 }
 0x194   : > { %v928_v2 = vadd.f32 %v921_v52, %v855_v62  ;;  %v856_v4 = vadd.f32 %v851_v51, %v783_v1 }
 0x195   : > { %v1517_v53 = vpop.f32.mrf.mxu0  ;;  %v1508_v54 = vpop.f32.mrf.mxu1 }
 0x197   : > { %v924_v55 = vpop.f32.mrf.mxu0 }
 0x198   : > { %v929_v8 = vadd.f32 %v924_v55, %v856_v4 }
 0x199   : > { %v1518_v56 = vpop.f32.mrf.mxu0 }
 0x1a7   : > { %v994_v63 = vpop.f32.mrf.mxu1 }
 0x1a8   : > { %v1001_v5 = vadd.f32 %v994_v63, %v928_v2 }
 0x1a9   : > { %v1527_v3 = vpop.f32.mrf.mxu1 }
 0x1ab   : > { %v997_v6 = vpop.f32.mrf.mxu1  ;;  %v1067_v7 = vpop.f32.mrf.mxu0 }
 0x1ac   : > { %v1074_v9 = vadd.f32 %v1067_v7, %v1001_v5  ;;  %v1002_v13 = vadd.f32 %v997_v6, %v929_v8 }
 0x1ad   : > { %v1537_v11 = vpop.f32.mrf.mxu0  ;;  %v1528_v12 = vpop.f32.mrf.mxu1 }
 0x1ae   : > { %v1088_v16 = vadd.f32 %v1081_v10, %v1074_v9 }
 0x1af   : > { %v1070_v14 = vpop.f32.mrf.mxu0 }
 0x1b0   : > { %v1075_v17 = vadd.f32 %v1070_v14, %v1002_v13  ;;  %v1097_v21 = vmul.f32 %v1399_v18, %v1088_v16 }
 0x1b1   : > { %v1538_v19 = vpop.f32.mrf.mxu0 }
 0x1b2   : > { %v1089_v20 = vadd.f32 %v1086_v15, %v1075_v17 }
 0x1b4   : > { %v1098_v22 = vmul.f32 %v1399_v18, %v1089_v20  ;;  %1112 = sbr.rel (%p1402_p10) target bundleno = 444 (0x1bc), region = 48 }
 0x1b6   : > { %v1411_v23 = vpack.c.bf16 %v1098_v22, %v1097_v21 }
 0x1b8   : > { %1412 = vst [vmem:[%s403_s25] sm:$0xff] %v1411_v23  }
 0x1b9   : > { %v1671_v24 = vmov 0.0  }
 0x1ba   : > { %1113 = vst [vmem:[#allocation2 + $0x10] sm:$0xff] %v1671_v24  ;;  %1114 = vst [vmem:[#allocation2] sm:$0xff] %v1671_v24 }
 0x1bb   : > { %1115 = vst [vmem:[#allocation2 + $0x18] sm:$0xff] %v1671_v24  ;;  %1116 = vst [vmem:[#allocation2 + $0x8] sm:$0xff] %v1671_v24 }
 0x1bc PF: > { %v1126_v28 = vmul.f32 %v1097_v21, %v1097_v21  ;;  %v1127_v0 = vmul.f32 %v1098_v22, %v1098_v22  ;;  %p1403_p11 = scmp.ne.s32.totalorder %s1642_s24, 3 }
 0x1c1   : > { %v1117_v25 = vld [vmem:[#allocation2 + $0x10] sm:$0xff]  ;;  %v1118_v26 = vld [vmem:[#allocation2] sm:$0xff]  ;;  %1135 = sbr.rel (%p1403_p11) target bundleno = 739 (0x2e3), region = 52 }
 0x1c2   : > { %v1124_v27 = vld [vmem:[#allocation2 + $0x18] sm:$0xff]  ;;  %v1119_v29 = vadd.f32 %v1117_v25, %v1097_v21  ;;  %v1120_v30 = vadd.f32 %v1118_v26, %v1098_v22  ;;  %v1125_v31 = vld [vmem:[#allocation2 + $0x8] sm:$0xff] }
 0x1c3   : > { %v1128_v32 = vadd.f32 %v1126_v28, %v1124_v27  ;;  %v1129_v33 = vadd.f32 %v1127_v0, %v1125_v31 }
 0x1c4   : > { %1121 = vst [vmem:[#allocation2 + $0x10] sm:$0xff] %v1119_v29  ;;  %1122 = vst [vmem:[#allocation2] sm:$0xff] %v1120_v30 }
 0x1c5   : > { %1130 = vst [vmem:[#allocation2 + $0x18] sm:$0xff] %v1128_v32  ;;  %1131 = vst [vmem:[#allocation2 + $0x8] sm:$0xff] %v1129_v33 }
 0x1cb   : > { %v1136_v34 = vld [vmem:[#allocation2 + $0x10] sm:$0xff]  ;;  %v1137_v35 = vld [vmem:[#allocation2] sm:$0xff] }
 0x1cc   : > { %v1148_v36 = vld [vmem:[#allocation2 + $0x18] sm:$0xff]  ;;  %v1138_v37 = vadd.f32 %v1137_v35, %v1136_v34  ;;  %v1149_v38 = vld [vmem:[#allocation2 + $0x8] sm:$0xff] }
 0x1cd   : > { %v1150_v39 = vadd.f32 %v1149_v38, %v1148_v36 }
 0x1ce   : > { %1139 = vadd.xlane.f32.xlu0 %v1138_v37 }
 0x1d2   : > { %1151 = vadd.xlane.f32.xlu0 %v1150_v39 }
 0x257   : > { %v1140_v40 = vpop.xlane.xlu0 %1139 }
 0x258   : > { %v1141_v41 = vrot.slane %v1140_v40, 4 }
 0x25a   : > { %v1142_v42 = vadd.f32 %v1141_v41, %v1140_v40 }
 0x25b   : > { %v1152_v43 = vpop.xlane.xlu0 %1151 }
 0x25c   : > { %v1143_v44 = vrot.slane %v1142_v42, 2  ;;  %v1153_v45 = vrot.slane %v1152_v43, 4 }
 0x25e   : > { %v1154_v46 = vadd.f32 %v1153_v45, %v1152_v43  ;;  %v1144_v47 = vadd.f32 %v1143_v44, %v1142_v42 }
 0x260   : > { %v1155_v48 = vrot.slane %v1154_v46, 2  ;;  %v1145_v49 = vrot.slane %v1144_v47, 1 }
 0x262   : > { %v1156_v50 = vadd.f32 %v1155_v48, %v1154_v46  ;;  %v1146_v51 = vadd.f32 %v1145_v49, %v1144_v47 }
 0x264   : > { %1540 = vpush %v1146_v51  ;;  %v1157_v52 = vrot.slane %v1156_v50, 1 }
 0x266   : > { %v1158_v53 = vadd.f32 %v1157_v52, %v1156_v50 }
 0x268   : > { %1542 = vpush %v1158_v53 }
 0x295   : > { %s1541_s24 = spop %1540 }
 0x296   : > { %s1162_s13 = smul.f32 0.00048828125, %s1541_s24 }
 0x298   : > { %v1172_v54 = vstv %s1162_s13  ;;  %s1166_s15 = smul.f32 %s1162_s13, %s1162_s13 }
 0x299   : > { %1173 = vst [vmem:[%s1752_s14] sm:$0x1] %v1172_v54  ;;  %s1543_s17 = spop %1542 }
 0x29a   : > { %s1165_s18 = smul.f32 0.00048828125, %s1543_s17 }
 0x29c   : > { %s1167_s16 = ssub.f32 %s1165_s18, %s1166_s15 }
 0x29e   : > { %s1168_s19 = sadd.f32 1e-05, %s1167_s16 }
 0x2a0   : > { %v1169_v55 = vstv %s1168_s19 }
 0x2a1   : > { %1618 = vrsqrt.f32 %v1169_v55 }
 0x2ae   : > { %v1619_v56 = vpop.eup %1618 }
 0x2af   : > { %1544 = vpush %v1619_v56 }
 0x2e0   : > { %s1545_s20 = spop %1544 }
 0x2e1   : > { %v1174_v57 = vstv %s1545_s20 }
 0x2e2   : > { %1175 = vst [vmem:[%s1752_s14 + $0x1] sm:$0x1] %v1174_v57 }
 0x2e3 PF: > { %s18_s28 = sadd.s32 1, %s1658_s28   ;;  %s1948_s24 = smov %s1650_s26 }
 0x2e4   : > { %p15_p12 = scmp.ge.s32.totalorder %s18_s28, 10   ;;  %s1949_s25 = smov %s1654_s27 }
 0x2e5   : > { %s1950_s26 = smov %s1953_s29  ;;  %s1951_s27 = smov %s1957_s30 }
 0x2e6   :  { %17 = sbr.rel (!%p15_p12) target bundleno = 3 (0x3), region = 109 }

</bundles_post_ra>
